<compile_context>
chip_gen: v5e
topology: v5e:2x2
jax: 0.10.0
libtpu: 0.0.40
codegen_flags: <defaults>
</compile_context>

<pallas_src>
import functools

import jax
import jax.numpy as jnp
from jax import lax
from jax.experimental import pallas as pl
from jax.experimental.pallas import tpu as pltpu


# ------------------------- Kernel 1: bi-LSTM last step ---------------------- #

def lstm_kernel(x_ref,                          # (S*B, E)   bf16, time-major rows
                wih_f_ref, whh_f_ref, b_f_ref,  # fwd LSTM: (E,4H) bf16, (H,4H) bf16, (1,4H) f32
                wih_b_ref, b_b_ref,             # bwd LSTM: (E,4H) bf16, (1,4H) f32
                h_out_ref,                      # (B, 2H)   bf16  [h_fwd | h_bwd]
                gates_ref,                      # scratch (S*B, 4H) f32
                *, seq_len, hidden_dim, unroll):
    SB, _ = x_ref.shape
    S = seq_len
    B = SB // S
    H = hidden_dim  # padded hidden (multiple of 128) -> gate slices lane-aligned

    # Hoisted input projection: one MXU-efficient GEMM for all timesteps,
    # bias folded in once.
    # TODO(synk): for v7x at production S, store this scratch in bf16 or tile
    # the GEMM over S so the full (S*B, 4H) f32 slab is never resident.
    gates_ref[...] = (jnp.dot(x_ref[...], wih_f_ref[...],
                              preferred_element_type=jnp.float32)
                      + b_f_ref[...])

    w_hh = whh_f_ref[...]
    # TODO(synk): on v6e/v7x, stage w_hh in the MXU across the loop via
    # pltpu.matmul_push_rhs / matmul_acc_lhs / matmul_pop (verify with a bundle
    # dump that the per-step RHS reload is actually on the critical path).

    def fwd_step(t, carry):
        h, c = carry                               # h: bf16, c: f32
        row = pl.multiple_of(t * B, B)
        gates = gates_ref[pl.ds(row, B), :] + jnp.dot(
            h, w_hh, preferred_element_type=jnp.float32)
        i = jax.nn.sigmoid(gates[:, 0:H])
        f = jax.nn.sigmoid(gates[:, H:2 * H])
        g = jnp.tanh(gates[:, 2 * H:3 * H])
        o = jax.nn.sigmoid(gates[:, 3 * H:4 * H])
        c_new = f * c + i * g
        h_new = (o * jnp.tanh(c_new)).astype(jnp.bfloat16)   # bf16 carry
        return h_new, c_new

    h0 = jnp.zeros((B, H), jnp.bfloat16)
    c0 = jnp.zeros((B, H), jnp.float32)
    h_fwd, _ = lax.fori_loop(0, S, fwd_step, (h0, c0), unroll=unroll)

    # Backward direction at position S-1: single step from zero state.
    # h0 == c0 == 0  =>  h@W_hh term and f*c term are dead work.
    x_last = x_ref[pl.ds((S - 1) * B, B), :]
    g_b = (jnp.dot(x_last, wih_b_ref[...], preferred_element_type=jnp.float32)
           + b_b_ref[...])
    i_b = jax.nn.sigmoid(g_b[:, 0:H])
    gg_b = jnp.tanh(g_b[:, 2 * H:3 * H])
    o_b = jax.nn.sigmoid(g_b[:, 3 * H:4 * H])
    h_bwd = o_b * jnp.tanh(i_b * gg_b)

    # Lane-aligned stores into the two halves (no concatenate op).
    h_out_ref[:, 0:H] = h_fwd
    h_out_ref[:, H:2 * H] = h_bwd.astype(jnp.bfloat16)


# ----------------- Kernel 2: fc logits, O-tiled ("parallel") ---------------- #

def fc_kernel(h_ref,      # (B, 2H)  bf16 (full, resident across the grid)
              wfc_ref,    # (2H, TO) bf16 tile (BlockSpec-pipelined)
              bfc_ref,    # (1, TO)  f32 tile (padded lanes = -1e30)
              logits_ref,  # (B, TO) f32 tile
              *, inv_temp):
    logits_ref[...] = (jnp.dot(h_ref[...], wfc_ref[...],
                               preferred_element_type=jnp.float32)
                       + bfc_ref[...]) * inv_temp


# ------------------------ Kernel 3: softmax epilogue ------------------------ #

def softmax_kernel(logits_ref, out_ref):
    l = logits_ref[...]
    l = l - jnp.max(l, axis=1, keepdims=True)       # stable softmax
    e = jnp.exp(l)
    s = jnp.sum(e, axis=1, keepdims=True)
    r = pl.reciprocal(s, approx=True)               # EUP slot
    r = r * (2.0 - s * r)                           # Newton step 1
    r = r * (2.0 - s * r)                           # Newton step 2 (f32-exact)
    out_ref[...] = e * r


# ------------------------------- Wrapper ------------------------------------ #

def _round_up(x, m):
    return ((x + m - 1) // m) * m


def _pad_gate_blocks(w, H, H_pad):
    """Pad a (..., 4*H) array (PyTorch gate order [i,f,g,o]) to (..., 4*H_pad)."""
    lead = w.shape[:-1]
    w4 = w.reshape(*lead, 4, H)
    w4 = jnp.pad(w4, [(0, 0)] * len(lead) + [(0, 0), (0, H_pad - H)])
    return w4.reshape(*lead, 4 * H_pad)


def _vmem_limit(nbytes, floor=16 << 20, cap=64 << 20):
    # Portable cap (v7x physical VMEM = 64 MiB); v5e/v6e could go higher.
    return int(min(cap, max(floor, int(nbytes * 1.5))))


def next_word_predictor(sequences, params, temperature=1.0):
    """sequences: (B, S) int32 token ids. Returns (B, O) float32 probabilities."""
    B, S = sequences.shape
    E = params["embedding"].shape[1]
    H = params["w_hh_f"].shape[0]
    O = params["w_fc"].shape[1]

    B_pad = _round_up(B, 8)      # sublane granularity
    E_pad = _round_up(E, 128)    # lane granularity
    H_pad = _round_up(H, 128)
    O_pad = _round_up(O, 128)

    # ---- Embedding: pad + cast the TABLE once; gather padded bf16 rows. ----
    emb_tbl = jnp.pad(params["embedding"],
                      ((0, 0), (0, E_pad - E))).astype(jnp.bfloat16)     # (V, E_pad)
    # Time-major gather: transpose the tiny id matrix BEFORE jnp.take so no
    # HBM transpose of the embedded sequence is needed; (S,B,E)->(S*B,E) is free.
    seq_t = jnp.pad(jnp.transpose(sequences), ((0, 0), (0, B_pad - B)))  # (S, B_pad)
    x_flat = jnp.take(emb_tbl, seq_t, axis=0).reshape(S * B_pad, E_pad)  # bf16
    # TODO(synk): training-mode dropout (p=0.2) not applied — eval/inference identity.
    # TODO(synk): for production E*S, gather inside the kernel instead
    # (PrefetchScalarGridSpec(num_scalar_prefetch=1) + pl.Element row-gather on
    # the embedding table) to skip the HBM activation entirely.

    # ---- pad / repack LSTM parameters (gate blocks padded individually) ----
    def pad_ih(w):   # (E, 4H) -> (E_pad, 4H_pad) bf16
        w = _pad_gate_blocks(w, H, H_pad)
        return jnp.pad(w, ((0, E_pad - E), (0, 0))).astype(jnp.bfloat16)

    def pad_hh(w):   # (H, 4H) -> (H_pad, 4H_pad) bf16
        w = _pad_gate_blocks(w, H, H_pad)
        return jnp.pad(w, ((0, H_pad - H), (0, 0))).astype(jnp.bfloat16)

    def pad_b(b):    # (1, 4H) -> (1, 4H_pad) f32
        return _pad_gate_blocks(b, H, H_pad).astype(jnp.float32)

    w_ih_f = pad_ih(params["w_ih_f"])
    w_hh_f = pad_hh(params["w_hh_f"])
    b_f = pad_b(params["b_f"])
    w_ih_b = pad_ih(params["w_ih_b"])
    b_b = pad_b(params["b_b"])
    # w_hh_b intentionally dropped: zero-state single step never uses it.

    # fc weight repacked to match the [h_fwd | h_bwd] layout of the h slab.
    w_fc = params["w_fc"]                                                # (2H, O)
    w_fc_p = jnp.zeros((2 * H_pad, O_pad), jnp.float32)
    w_fc_p = w_fc_p.at[:H, :O].set(w_fc[:H])
    w_fc_p = w_fc_p.at[H_pad:H_pad + H, :O].set(w_fc[H:])
    w_fc_p = w_fc_p.astype(jnp.bfloat16)
    b_fc = jnp.pad(params["b_fc"].astype(jnp.float32),
                   ((0, 0), (0, O_pad - O)), constant_values=-1e30)

    vmem = pl.BlockSpec(memory_space=pltpu.MemorySpace.VMEM)

    # ---------------- call 1: bi-LSTM recurrence -> h slab ------------------ #
    gates_bytes = S * B_pad * 4 * H_pad * 4
    h_bytes = B_pad * 2 * H_pad * 2
    k1_bytes = (x_flat.size * 2 + w_ih_f.size * 2 + w_hh_f.size * 2
                + w_ih_b.size * 2 + b_f.size * 4 + b_b.size * 4
                + gates_bytes + h_bytes)
    lstm = functools.partial(lstm_kernel, seq_len=S, hidden_dim=H_pad,
                             unroll=min(S, 8))
    h_cat = pl.pallas_call(
        lstm,
        out_shape=jax.ShapeDtypeStruct((B_pad, 2 * H_pad), jnp.bfloat16),
        in_specs=[vmem] * 6,
        out_specs=vmem,
        scratch_shapes=[pltpu.VMEM((S * B_pad, 4 * H_pad), jnp.float32)],
        compiler_params=pltpu.CompilerParams(
            vmem_limit_bytes=_vmem_limit(k1_bytes)),
    )(x_flat, w_ih_f, w_hh_f, b_f, w_ih_b, b_b)

    # ---------------- call 2: fc logits, O-tiled, parallel axis ------------- #
    TO = 512
    while O_pad % TO:
        TO //= 2                                  # lands on a multiple of 128
    n_tiles = O_pad // TO
    k2_bytes = h_bytes + 2 * (2 * H_pad * TO * 2 + TO * 4 + B_pad * TO * 4)
    fc = functools.partial(fc_kernel, inv_temp=float(1.0 / temperature))
    logits = pl.pallas_call(
        fc,
        out_shape=jax.ShapeDtypeStruct((B_pad, O_pad), jnp.float32),
        grid=(n_tiles,),
        in_specs=[pl.BlockSpec((B_pad, 2 * H_pad), lambda j: (0, 0)),
                  pl.BlockSpec((2 * H_pad, TO), lambda j: (0, j)),
                  pl.BlockSpec((1, TO), lambda j: (0, j))],
        out_specs=pl.BlockSpec((B_pad, TO), lambda j: (0, j)),
        compiler_params=pltpu.CompilerParams(
            dimension_semantics=("parallel",),
            vmem_limit_bytes=_vmem_limit(k2_bytes)),
    )(h_cat, w_fc_p, b_fc)

    # ---------------- call 3: softmax over the full vocab slab -------------- #
    k3_bytes = 2 * B_pad * O_pad * 4
    probs = pl.pallas_call(
        softmax_kernel,
        out_shape=jax.ShapeDtypeStruct((B_pad, O_pad), jnp.float32),
        in_specs=[vmem],
        out_specs=vmem,
        compiler_params=pltpu.CompilerParams(
            vmem_limit_bytes=_vmem_limit(k3_bytes)),
    )(logits)

    return probs[:B, :O]


# --------------------------- Pure-JAX reference ----------------------------- #

def _ref_cell(x_t, h, c, w_ih, w_hh, b, H):
    gates = x_t @ w_ih + h @ w_hh + b
    i = jax.nn.sigmoid(gates[:, 0:H])
    f = jax.nn.sigmoid(gates[:, H:2 * H])
    g = jnp.tanh(gates[:, 2 * H:3 * H])
    o = jax.nn.sigmoid(gates[:, 3 * H:4 * H])
    c_new = f * c + i * g
    return o * jnp.tanh(c_new), c_new


def reference(sequences, params, temperature=1.0):
    emb = jnp.take(params["embedding"], sequences, axis=0).astype(jnp.float32)
    x = jnp.transpose(emb, (1, 0, 2))                            # (S, B, E)
    B = sequences.shape[0]
    H = params["w_hh_f"].shape[0]
    h0 = jnp.zeros((B, H), jnp.float32)
    c0 = jnp.zeros((B, H), jnp.float32)

    def make_step(w_ih, w_hh, b):
        def step(carry, x_t):
            h, c = _ref_cell(x_t, carry[0], carry[1], w_ih, w_hh, b, H)
            return (h, c), h
        return step

    _, hs_f = lax.scan(make_step(params["w_ih_f"], params["w_hh_f"], params["b_f"]),
                       (h0, c0), x)
    _, hs_b = lax.scan(make_step(params["w_ih_b"], params["w_hh_b"], params["b_b"]),
                       (h0, c0), x[::-1])
    hs_b = hs_b[::-1]                                            # align to positions
    last_hidden = jnp.concatenate([hs_f[-1], hs_b[-1]], axis=-1)  # lstm_out[:, -1, :]
    logits = last_hidden @ params["w_fc"] + params["b_fc"]
    return jax.nn.softmax(logits / temperature, axis=1)


# --------------------------------- Main ------------------------------------- #

def init_params(key, vocab_size, embed_dim, hidden_dim, output_dim):
    ks = jax.random.split(key, 12)
    H, E, O = hidden_dim, embed_dim, output_dim
    s = 1.0 / jnp.sqrt(H)

    def u(k, shape):
        return jax.random.uniform(k, shape, jnp.float32, -s, s)

    return {
        "embedding": jax.random.normal(ks[0], (vocab_size, E), jnp.float32),
        # forward direction (weights pre-transposed, biases combined)
        "w_ih_f": u(ks[1], (E, 4 * H)),
        "w_hh_f": u(ks[2], (H, 4 * H)),
        "b_f":    u(ks[3], (1, 4 * H)) + u(ks[4], (1, 4 * H)),
        # backward direction
        "w_ih_b": u(ks[5], (E, 4 * H)),
        "w_hh_b": u(ks[6], (H, 4 * H)),
        "b_b":    u(ks[7], (1, 4 * H)) + u(ks[8], (1, 4 * H)),
        # fc: Linear(2H -> O), weight stored transposed (2H, O)
        "w_fc":   jax.random.uniform(ks[9], (2 * H, O), jnp.float32,
                                     -1.0 / jnp.sqrt(2 * H), 1.0 / jnp.sqrt(2 * H)),
        "b_fc":   jax.random.uniform(ks[10], (1, O), jnp.float32,
                                     -1.0 / jnp.sqrt(2 * H), 1.0 / jnp.sqrt(2 * H)),
    }


if __name__ == "__main__":
    vocab_size, embed_dim, hidden_dim, output_dim = 64, 32, 32, 64
    batch, seq_len = 2, 8
    temperature = 1.0

    key = jax.random.PRNGKey(0)
    k_param, k_seq = jax.random.split(key)
    params = init_params(k_param, vocab_size, embed_dim, hidden_dim, output_dim)
    sequences = jax.random.randint(k_seq, (batch, seq_len), 0, vocab_size, jnp.int32)

    probs = next_word_predictor(sequences, params, temperature)
    probs = jax.block_until_ready(probs)

    ref = jax.block_until_ready(reference(sequences, params, temperature))
    assert probs.shape == (batch, output_dim)
    assert jnp.allclose(jnp.sum(probs, axis=1), 1.0, atol=1e-5)
    # bf16 matmul operands (f32 accumulation) -> slightly relaxed tolerance
    # vs the pure-f32 reference.
    assert jnp.allclose(probs, ref, atol=2e-3, rtol=2e-2)

    print("KERNEL_OK")
</pallas_src>

<mosaic_0001>
module attributes {stable_mosaic.version = 11 : i64} {
  func.func @lstm_kernel(%arg0: memref<64x128xbf16, #tpu.memory_space<vmem>>, %arg1: memref<128x512xbf16, #tpu.memory_space<vmem>>, %arg2: memref<128x512xbf16, #tpu.memory_space<vmem>>, %arg3: memref<1x512xf32, #tpu.memory_space<vmem>>, %arg4: memref<128x512xbf16, #tpu.memory_space<vmem>>, %arg5: memref<1x512xf32, #tpu.memory_space<vmem>>, %arg6: memref<8x256xbf16, #tpu.memory_space<vmem>>, %arg7: memref<64x512xf32, #tpu.memory_space<vmem>>) attributes {dimension_semantics = [], scalar_prefetch = 0 : i64, scratch_operands = 1 : i64, tpu.core_type = #tpu.core_type<tc>} {
    %c0 = arith.constant 0 : index
    %c0_0 = arith.constant 0 : index
    %0 = vector.load %arg0[%c0, %c0_0] : memref<64x128xbf16, #tpu.memory_space<vmem>>, vector<64x128xbf16>
    %c0_1 = arith.constant 0 : index
    %c0_2 = arith.constant 0 : index
    %1 = vector.load %arg1[%c0_1, %c0_2] : memref<128x512xbf16, #tpu.memory_space<vmem>>, vector<128x512xbf16>
    %cst = arith.constant dense<0.000000e+00> : vector<64x512xf32>
    %2 = tpu.matmul %0, %1, %cst {dimension_numbers = #tpu.dot_dimension_numbers<[1], [0], [0], [1], [0, 0, 1, 1], [], []>} : vector<64x128xbf16>, vector<128x512xbf16>, vector<64x512xf32> -> vector<64x512xf32>
    %c0_3 = arith.constant 0 : index
    %c0_4 = arith.constant 0 : index
    %3 = vector.load %arg3[%c0_3, %c0_4] : memref<1x512xf32, #tpu.memory_space<vmem>>, vector<1x512xf32>
    %4 = vector.broadcast %3 : vector<1x512xf32> to vector<64x512xf32>
    %5 = arith.addf %2, %4 : vector<64x512xf32>
    %c0_5 = arith.constant 0 : index
    %c0_6 = arith.constant 0 : index
    %6 = vector.load %arg7[%c0_5, %c0_6] : memref<64x512xf32, #tpu.memory_space<vmem>>, vector<64x512xf32>
    tpu.vector_store %arg7[%c0_5, %c0_6], %5 {strides = array<i32>} : memref<64x512xf32, #tpu.memory_space<vmem>>, vector<64x512xf32>,
    %c0_7 = arith.constant 0 : index
    %c0_8 = arith.constant 0 : index
    %7 = vector.load %arg2[%c0_7, %c0_8] : memref<128x512xbf16, #tpu.memory_space<vmem>>, vector<128x512xbf16>
    %cst_9 = arith.constant 0.000000e+00 : bf16
    %8 = vector.broadcast %cst_9 : bf16 to vector<8x128xbf16>
    %cst_10 = arith.constant 0.000000e+00 : f32
    %9 = vector.broadcast %cst_10 : f32 to vector<8x128xf32>
    %c0_i32 = arith.constant 0 : i32
    %c8_i32 = arith.constant 8 : i32
    %10 = arith.muli %c0_i32, %c8_i32 : i32
    %11 = tpu.assume_multiple %10, 8 : i32
    %12 = arith.index_cast %11 : i32 to index
    %c0_11 = arith.constant 0 : index
    %13 = vector.load %arg7[%12, %c0_11] : memref<64x512xf32, #tpu.memory_space<vmem>>, vector<8x512xf32>
    %cst_12 = arith.constant dense<0.000000e+00> : vector<8x512xf32>
    %14 = tpu.matmul %8, %7, %cst_12 {dimension_numbers = #tpu.dot_dimension_numbers<[1], [0], [0], [1], [0, 0, 1, 1], [], []>} : vector<8x128xbf16>, vector<128x512xbf16>, vector<8x512xf32> -> vector<8x512xf32>
    %15 = arith.addf %13, %14 : vector<8x512xf32>
    %16 = vector.extract_strided_slice %15 {offsets = [0, 0], sizes = [8, 128], strides = [1, 1]} : vector<8x512xf32> to vector<8x128xf32>
    %17 = arith.negf %16 : vector<8x128xf32>
    %18 = math.exp %17 : vector<8x128xf32>
    %cst_13 = arith.constant 1.000000e+00 : f32
    %19 = vector.broadcast %cst_13 : f32 to vector<8x128xf32>
    %20 = arith.addf %19, %18 : vector<8x128xf32>
    %21 = arith.divf %19, %20 : vector<8x128xf32>
    %22 = vector.extract_strided_slice %15 {offsets = [0, 128], sizes = [8, 128], strides = [1, 1]} : vector<8x512xf32> to vector<8x128xf32>
    %23 = arith.negf %22 : vector<8x128xf32>
    %24 = math.exp %23 : vector<8x128xf32>
    %cst_14 = arith.constant 1.000000e+00 : f32
    %25 = vector.broadcast %cst_14 : f32 to vector<8x128xf32>
    %26 = arith.addf %25, %24 : vector<8x128xf32>
    %27 = arith.divf %25, %26 : vector<8x128xf32>
    %28 = vector.extract_strided_slice %15 {offsets = [0, 256], sizes = [8, 128], strides = [1, 1]} : vector<8x512xf32> to vector<8x128xf32>
    %29 = math.tanh %28 : vector<8x128xf32>
    %30 = vector.extract_strided_slice %15 {offsets = [0, 384], sizes = [8, 128], strides = [1, 1]} : vector<8x512xf32> to vector<8x128xf32>
    %31 = arith.negf %30 : vector<8x128xf32>
    %32 = math.exp %31 : vector<8x128xf32>
    %cst_15 = arith.constant 1.000000e+00 : f32
    %33 = vector.broadcast %cst_15 : f32 to vector<8x128xf32>
    %34 = arith.addf %33, %32 : vector<8x128xf32>
    %35 = arith.divf %33, %34 : vector<8x128xf32>
    %36 = arith.mulf %27, %9 : vector<8x128xf32>
    %37 = arith.mulf %21, %29 : vector<8x128xf32>
    %38 = arith.addf %36, %37 : vector<8x128xf32>
    %39 = math.tanh %38 : vector<8x128xf32>
    %40 = arith.mulf %35, %39 : vector<8x128xf32>
    %41 = arith.truncf %40 : vector<8x128xf32> to vector<8x128xbf16>
    %c1_i32 = arith.constant 1 : i32
    %c8_i32_16 = arith.constant 8 : i32
    %42 = arith.muli %c1_i32, %c8_i32_16 : i32
    %43 = tpu.assume_multiple %42, 8 : i32
    %44 = arith.index_cast %43 : i32 to index
    %c0_17 = arith.constant 0 : index
    %45 = vector.load %arg7[%44, %c0_17] : memref<64x512xf32, #tpu.memory_space<vmem>>, vector<8x512xf32>
    %cst_18 = arith.constant dense<0.000000e+00> : vector<8x512xf32>
    %46 = tpu.matmul %41, %7, %cst_18 {dimension_numbers = #tpu.dot_dimension_numbers<[1], [0], [0], [1], [0, 0, 1, 1], [], []>} : vector<8x128xbf16>, vector<128x512xbf16>, vector<8x512xf32> -> vector<8x512xf32>
    %47 = arith.addf %45, %46 : vector<8x512xf32>
    %48 = vector.extract_strided_slice %47 {offsets = [0, 0], sizes = [8, 128], strides = [1, 1]} : vector<8x512xf32> to vector<8x128xf32>
    %49 = arith.negf %48 : vector<8x128xf32>
    %50 = math.exp %49 : vector<8x128xf32>
    %cst_19 = arith.constant 1.000000e+00 : f32
    %51 = vector.broadcast %cst_19 : f32 to vector<8x128xf32>
    %52 = arith.addf %51, %50 : vector<8x128xf32>
    %53 = arith.divf %51, %52 : vector<8x128xf32>
    %54 = vector.extract_strided_slice %47 {offsets = [0, 128], sizes = [8, 128], strides = [1, 1]} : vector<8x512xf32> to vector<8x128xf32>
    %55 = arith.negf %54 : vector<8x128xf32>
    %56 = math.exp %55 : vector<8x128xf32>
    %cst_20 = arith.constant 1.000000e+00 : f32
    %57 = vector.broadcast %cst_20 : f32 to vector<8x128xf32>
    %58 = arith.addf %57, %56 : vector<8x128xf32>
    %59 = arith.divf %57, %58 : vector<8x128xf32>
    %60 = vector.extract_strided_slice %47 {offsets = [0, 256], sizes = [8, 128], strides = [1, 1]} : vector<8x512xf32> to vector<8x128xf32>
    %61 = math.tanh %60 : vector<8x128xf32>
    %62 = vector.extract_strided_slice %47 {offsets = [0, 384], sizes = [8, 128], strides = [1, 1]} : vector<8x512xf32> to vector<8x128xf32>
    %63 = arith.negf %62 : vector<8x128xf32>
    %64 = math.exp %63 : vector<8x128xf32>
    %cst_21 = arith.constant 1.000000e+00 : f32
    %65 = vector.broadcast %cst_21 : f32 to vector<8x128xf32>
    %66 = arith.addf %65, %64 : vector<8x128xf32>
    %67 = arith.divf %65, %66 : vector<8x128xf32>
    %68 = arith.mulf %59, %38 : vector<8x128xf32>
    %69 = arith.mulf %53, %61 : vector<8x128xf32>
    %70 = arith.addf %68, %69 : vector<8x128xf32>
    %71 = math.tanh %70 : vector<8x128xf32>
    %72 = arith.mulf %67, %71 : vector<8x128xf32>
    %73 = arith.truncf %72 : vector<8x128xf32> to vector<8x128xbf16>
    %c2_i32 = arith.constant 2 : i32
    %c8_i32_22 = arith.constant 8 : i32
    %74 = arith.muli %c2_i32, %c8_i32_22 : i32
    %75 = tpu.assume_multiple %74, 8 : i32
    %76 = arith.index_cast %75 : i32 to index
    %c0_23 = arith.constant 0 : index
    %77 = vector.load %arg7[%76, %c0_23] : memref<64x512xf32, #tpu.memory_space<vmem>>, vector<8x512xf32>
    %cst_24 = arith.constant dense<0.000000e+00> : vector<8x512xf32>
    %78 = tpu.matmul %73, %7, %cst_24 {dimension_numbers = #tpu.dot_dimension_numbers<[1], [0], [0], [1], [0, 0, 1, 1], [], []>} : vector<8x128xbf16>, vector<128x512xbf16>, vector<8x512xf32> -> vector<8x512xf32>
    %79 = arith.addf %77, %78 : vector<8x512xf32>
    %80 = vector.extract_strided_slice %79 {offsets = [0, 0], sizes = [8, 128], strides = [1, 1]} : vector<8x512xf32> to vector<8x128xf32>
    %81 = arith.negf %80 : vector<8x128xf32>
    %82 = math.exp %81 : vector<8x128xf32>
    %cst_25 = arith.constant 1.000000e+00 : f32
    %83 = vector.broadcast %cst_25 : f32 to vector<8x128xf32>
    %84 = arith.addf %83, %82 : vector<8x128xf32>
    %85 = arith.divf %83, %84 : vector<8x128xf32>
    %86 = vector.extract_strided_slice %79 {offsets = [0, 128], sizes = [8, 128], strides = [1, 1]} : vector<8x512xf32> to vector<8x128xf32>
    %87 = arith.negf %86 : vector<8x128xf32>
    %88 = math.exp %87 : vector<8x128xf32>
    %cst_26 = arith.constant 1.000000e+00 : f32
    %89 = vector.broadcast %cst_26 : f32 to vector<8x128xf32>
    %90 = arith.addf %89, %88 : vector<8x128xf32>
    %91 = arith.divf %89, %90 : vector<8x128xf32>
    %92 = vector.extract_strided_slice %79 {offsets = [0, 256], sizes = [8, 128], strides = [1, 1]} : vector<8x512xf32> to vector<8x128xf32>
    %93 = math.tanh %92 : vector<8x128xf32>
    %94 = vector.extract_strided_slice %79 {offsets = [0, 384], sizes = [8, 128], strides = [1, 1]} : vector<8x512xf32> to vector<8x128xf32>
    %95 = arith.negf %94 : vector<8x128xf32>
    %96 = math.exp %95 : vector<8x128xf32>
    %cst_27 = arith.constant 1.000000e+00 : f32
    %97 = vector.broadcast %cst_27 : f32 to vector<8x128xf32>
    %98 = arith.addf %97, %96 : vector<8x128xf32>
    %99 = arith.divf %97, %98 : vector<8x128xf32>
    %100 = arith.mulf %91, %70 : vector<8x128xf32>
    %101 = arith.mulf %85, %93 : vector<8x128xf32>
    %102 = arith.addf %100, %101 : vector<8x128xf32>
    %103 = math.tanh %102 : vector<8x128xf32>
    %104 = arith.mulf %99, %103 : vector<8x128xf32>
    %105 = arith.truncf %104 : vector<8x128xf32> to vector<8x128xbf16>
    %c3_i32 = arith.constant 3 : i32
    %c8_i32_28 = arith.constant 8 : i32
    %106 = arith.muli %c3_i32, %c8_i32_28 : i32
    %107 = tpu.assume_multiple %106, 8 : i32
    %108 = arith.index_cast %107 : i32 to index
    %c0_29 = arith.constant 0 : index
    %109 = vector.load %arg7[%108, %c0_29] : memref<64x512xf32, #tpu.memory_space<vmem>>, vector<8x512xf32>
    %cst_30 = arith.constant dense<0.000000e+00> : vector<8x512xf32>
    %110 = tpu.matmul %105, %7, %cst_30 {dimension_numbers = #tpu.dot_dimension_numbers<[1], [0], [0], [1], [0, 0, 1, 1], [], []>} : vector<8x128xbf16>, vector<128x512xbf16>, vector<8x512xf32> -> vector<8x512xf32>
    %111 = arith.addf %109, %110 : vector<8x512xf32>
    %112 = vector.extract_strided_slice %111 {offsets = [0, 0], sizes = [8, 128], strides = [1, 1]} : vector<8x512xf32> to vector<8x128xf32>
    %113 = arith.negf %112 : vector<8x128xf32>
    %114 = math.exp %113 : vector<8x128xf32>
    %cst_31 = arith.constant 1.000000e+00 : f32
    %115 = vector.broadcast %cst_31 : f32 to vector<8x128xf32>
    %116 = arith.addf %115, %114 : vector<8x128xf32>
    %117 = arith.divf %115, %116 : vector<8x128xf32>
    %118 = vector.extract_strided_slice %111 {offsets = [0, 128], sizes = [8, 128], strides = [1, 1]} : vector<8x512xf32> to vector<8x128xf32>
    %119 = arith.negf %118 : vector<8x128xf32>
    %120 = math.exp %119 : vector<8x128xf32>
    %cst_32 = arith.constant 1.000000e+00 : f32
    %121 = vector.broadcast %cst_32 : f32 to vector<8x128xf32>
    %122 = arith.addf %121, %120 : vector<8x128xf32>
    %123 = arith.divf %121, %122 : vector<8x128xf32>
    %124 = vector.extract_strided_slice %111 {offsets = [0, 256], sizes = [8, 128], strides = [1, 1]} : vector<8x512xf32> to vector<8x128xf32>
    %125 = math.tanh %124 : vector<8x128xf32>
    %126 = vector.extract_strided_slice %111 {offsets = [0, 384], sizes = [8, 128], strides = [1, 1]} : vector<8x512xf32> to vector<8x128xf32>
    %127 = arith.negf %126 : vector<8x128xf32>
    %128 = math.exp %127 : vector<8x128xf32>
    %cst_33 = arith.constant 1.000000e+00 : f32
    %129 = vector.broadcast %cst_33 : f32 to vector<8x128xf32>
    %130 = arith.addf %129, %128 : vector<8x128xf32>
    %131 = arith.divf %129, %130 : vector<8x128xf32>
    %132 = arith.mulf %123, %102 : vector<8x128xf32>
    %133 = arith.mulf %117, %125 : vector<8x128xf32>
    %134 = arith.addf %132, %133 : vector<8x128xf32>
    %135 = math.tanh %134 : vector<8x128xf32>
    %136 = arith.mulf %131, %135 : vector<8x128xf32>
    %137 = arith.truncf %136 : vector<8x128xf32> to vector<8x128xbf16>
    %c4_i32 = arith.constant 4 : i32
    %c8_i32_34 = arith.constant 8 : i32
    %138 = arith.muli %c4_i32, %c8_i32_34 : i32
    %139 = tpu.assume_multiple %138, 8 : i32
    %140 = arith.index_cast %139 : i32 to index
    %c0_35 = arith.constant 0 : index
    %141 = vector.load %arg7[%140, %c0_35] : memref<64x512xf32, #tpu.memory_space<vmem>>, vector<8x512xf32>
    %cst_36 = arith.constant dense<0.000000e+00> : vector<8x512xf32>
    %142 = tpu.matmul %137, %7, %cst_36 {dimension_numbers = #tpu.dot_dimension_numbers<[1], [0], [0], [1], [0, 0, 1, 1], [], []>} : vector<8x128xbf16>, vector<128x512xbf16>, vector<8x512xf32> -> vector<8x512xf32>
    %143 = arith.addf %141, %142 : vector<8x512xf32>
    %144 = vector.extract_strided_slice %143 {offsets = [0, 0], sizes = [8, 128], strides = [1, 1]} : vector<8x512xf32> to vector<8x128xf32>
    %145 = arith.negf %144 : vector<8x128xf32>
    %146 = math.exp %145 : vector<8x128xf32>
    %cst_37 = arith.constant 1.000000e+00 : f32
    %147 = vector.broadcast %cst_37 : f32 to vector<8x128xf32>
    %148 = arith.addf %147, %146 : vector<8x128xf32>
    %149 = arith.divf %147, %148 : vector<8x128xf32>
    %150 = vector.extract_strided_slice %143 {offsets = [0, 128], sizes = [8, 128], strides = [1, 1]} : vector<8x512xf32> to vector<8x128xf32>
    %151 = arith.negf %150 : vector<8x128xf32>
    %152 = math.exp %151 : vector<8x128xf32>
    %cst_38 = arith.constant 1.000000e+00 : f32
    %153 = vector.broadcast %cst_38 : f32 to vector<8x128xf32>
    %154 = arith.addf %153, %152 : vector<8x128xf32>
    %155 = arith.divf %153, %154 : vector<8x128xf32>
    %156 = vector.extract_strided_slice %143 {offsets = [0, 256], sizes = [8, 128], strides = [1, 1]} : vector<8x512xf32> to vector<8x128xf32>
    %157 = math.tanh %156 : vector<8x128xf32>
    %158 = vector.extract_strided_slice %143 {offsets = [0, 384], sizes = [8, 128], strides = [1, 1]} : vector<8x512xf32> to vector<8x128xf32>
    %159 = arith.negf %158 : vector<8x128xf32>
    %160 = math.exp %159 : vector<8x128xf32>
    %cst_39 = arith.constant 1.000000e+00 : f32
    %161 = vector.broadcast %cst_39 : f32 to vector<8x128xf32>
    %162 = arith.addf %161, %160 : vector<8x128xf32>
    %163 = arith.divf %161, %162 : vector<8x128xf32>
    %164 = arith.mulf %155, %134 : vector<8x128xf32>
    %165 = arith.mulf %149, %157 : vector<8x128xf32>
    %166 = arith.addf %164, %165 : vector<8x128xf32>
    %167 = math.tanh %166 : vector<8x128xf32>
    %168 = arith.mulf %163, %167 : vector<8x128xf32>
    %169 = arith.truncf %168 : vector<8x128xf32> to vector<8x128xbf16>
    %c5_i32 = arith.constant 5 : i32
    %c8_i32_40 = arith.constant 8 : i32
    %170 = arith.muli %c5_i32, %c8_i32_40 : i32
    %171 = tpu.assume_multiple %170, 8 : i32
    %172 = arith.index_cast %171 : i32 to index
    %c0_41 = arith.constant 0 : index
    %173 = vector.load %arg7[%172, %c0_41] : memref<64x512xf32, #tpu.memory_space<vmem>>, vector<8x512xf32>
    %cst_42 = arith.constant dense<0.000000e+00> : vector<8x512xf32>
    %174 = tpu.matmul %169, %7, %cst_42 {dimension_numbers = #tpu.dot_dimension_numbers<[1], [0], [0], [1], [0, 0, 1, 1], [], []>} : vector<8x128xbf16>, vector<128x512xbf16>, vector<8x512xf32> -> vector<8x512xf32>
    %175 = arith.addf %173, %174 : vector<8x512xf32>
    %176 = vector.extract_strided_slice %175 {offsets = [0, 0], sizes = [8, 128], strides = [1, 1]} : vector<8x512xf32> to vector<8x128xf32>
    %177 = arith.negf %176 : vector<8x128xf32>
    %178 = math.exp %177 : vector<8x128xf32>
    %cst_43 = arith.constant 1.000000e+00 : f32
    %179 = vector.broadcast %cst_43 : f32 to vector<8x128xf32>
    %180 = arith.addf %179, %178 : vector<8x128xf32>
    %181 = arith.divf %179, %180 : vector<8x128xf32>
    %182 = vector.extract_strided_slice %175 {offsets = [0, 128], sizes = [8, 128], strides = [1, 1]} : vector<8x512xf32> to vector<8x128xf32>
    %183 = arith.negf %182 : vector<8x128xf32>
    %184 = math.exp %183 : vector<8x128xf32>
    %cst_44 = arith.constant 1.000000e+00 : f32
    %185 = vector.broadcast %cst_44 : f32 to vector<8x128xf32>
    %186 = arith.addf %185, %184 : vector<8x128xf32>
    %187 = arith.divf %185, %186 : vector<8x128xf32>
    %188 = vector.extract_strided_slice %175 {offsets = [0, 256], sizes = [8, 128], strides = [1, 1]} : vector<8x512xf32> to vector<8x128xf32>
    %189 = math.tanh %188 : vector<8x128xf32>
    %190 = vector.extract_strided_slice %175 {offsets = [0, 384], sizes = [8, 128], strides = [1, 1]} : vector<8x512xf32> to vector<8x128xf32>
    %191 = arith.negf %190 : vector<8x128xf32>
    %192 = math.exp %191 : vector<8x128xf32>
    %cst_45 = arith.constant 1.000000e+00 : f32
    %193 = vector.broadcast %cst_45 : f32 to vector<8x128xf32>
    %194 = arith.addf %193, %192 : vector<8x128xf32>
    %195 = arith.divf %193, %194 : vector<8x128xf32>
    %196 = arith.mulf %187, %166 : vector<8x128xf32>
    %197 = arith.mulf %181, %189 : vector<8x128xf32>
    %198 = arith.addf %196, %197 : vector<8x128xf32>
    %199 = math.tanh %198 : vector<8x128xf32>
    %200 = arith.mulf %195, %199 : vector<8x128xf32>
    %201 = arith.truncf %200 : vector<8x128xf32> to vector<8x128xbf16>
    %c6_i32 = arith.constant 6 : i32
    %c8_i32_46 = arith.constant 8 : i32
    %202 = arith.muli %c6_i32, %c8_i32_46 : i32
    %203 = tpu.assume_multiple %202, 8 : i32
    %204 = arith.index_cast %203 : i32 to index
    %c0_47 = arith.constant 0 : index
    %205 = vector.load %arg7[%204, %c0_47] : memref<64x512xf32, #tpu.memory_space<vmem>>, vector<8x512xf32>
    %cst_48 = arith.constant dense<0.000000e+00> : vector<8x512xf32>
    %206 = tpu.matmul %201, %7, %cst_48 {dimension_numbers = #tpu.dot_dimension_numbers<[1], [0], [0], [1], [0, 0, 1, 1], [], []>} : vector<8x128xbf16>, vector<128x512xbf16>, vector<8x512xf32> -> vector<8x512xf32>
    %207 = arith.addf %205, %206 : vector<8x512xf32>
    %208 = vector.extract_strided_slice %207 {offsets = [0, 0], sizes = [8, 128], strides = [1, 1]} : vector<8x512xf32> to vector<8x128xf32>
    %209 = arith.negf %208 : vector<8x128xf32>
    %210 = math.exp %209 : vector<8x128xf32>
    %cst_49 = arith.constant 1.000000e+00 : f32
    %211 = vector.broadcast %cst_49 : f32 to vector<8x128xf32>
    %212 = arith.addf %211, %210 : vector<8x128xf32>
    %213 = arith.divf %211, %212 : vector<8x128xf32>
    %214 = vector.extract_strided_slice %207 {offsets = [0, 128], sizes = [8, 128], strides = [1, 1]} : vector<8x512xf32> to vector<8x128xf32>
    %215 = arith.negf %214 : vector<8x128xf32>
    %216 = math.exp %215 : vector<8x128xf32>
    %cst_50 = arith.constant 1.000000e+00 : f32
    %217 = vector.broadcast %cst_50 : f32 to vector<8x128xf32>
    %218 = arith.addf %217, %216 : vector<8x128xf32>
    %219 = arith.divf %217, %218 : vector<8x128xf32>
    %220 = vector.extract_strided_slice %207 {offsets = [0, 256], sizes = [8, 128], strides = [1, 1]} : vector<8x512xf32> to vector<8x128xf32>
    %221 = math.tanh %220 : vector<8x128xf32>
    %222 = vector.extract_strided_slice %207 {offsets = [0, 384], sizes = [8, 128], strides = [1, 1]} : vector<8x512xf32> to vector<8x128xf32>
    %223 = arith.negf %222 : vector<8x128xf32>
    %224 = math.exp %223 : vector<8x128xf32>
    %cst_51 = arith.constant 1.000000e+00 : f32
    %225 = vector.broadcast %cst_51 : f32 to vector<8x128xf32>
    %226 = arith.addf %225, %224 : vector<8x128xf32>
    %227 = arith.divf %225, %226 : vector<8x128xf32>
    %228 = arith.mulf %219, %198 : vector<8x128xf32>
    %229 = arith.mulf %213, %221 : vector<8x128xf32>
    %230 = arith.addf %228, %229 : vector<8x128xf32>
    %231 = math.tanh %230 : vector<8x128xf32>
    %232 = arith.mulf %227, %231 : vector<8x128xf32>
    %233 = arith.truncf %232 : vector<8x128xf32> to vector<8x128xbf16>
    %c7_i32 = arith.constant 7 : i32
    %c8_i32_52 = arith.constant 8 : i32
    %234 = arith.muli %c7_i32, %c8_i32_52 : i32
    %235 = tpu.assume_multiple %234, 8 : i32
    %236 = arith.index_cast %235 : i32 to index
    %c0_53 = arith.constant 0 : index
    %237 = vector.load %arg7[%236, %c0_53] : memref<64x512xf32, #tpu.memory_space<vmem>>, vector<8x512xf32>
    %cst_54 = arith.constant dense<0.000000e+00> : vector<8x512xf32>
    %238 = tpu.matmul %233, %7, %cst_54 {dimension_numbers = #tpu.dot_dimension_numbers<[1], [0], [0], [1], [0, 0, 1, 1], [], []>} : vector<8x128xbf16>, vector<128x512xbf16>, vector<8x512xf32> -> vector<8x512xf32>
    %239 = arith.addf %237, %238 : vector<8x512xf32>
    %240 = vector.extract_strided_slice %239 {offsets = [0, 0], sizes = [8, 128], strides = [1, 1]} : vector<8x512xf32> to vector<8x128xf32>
    %241 = arith.negf %240 : vector<8x128xf32>
    %242 = math.exp %241 : vector<8x128xf32>
    %cst_55 = arith.constant 1.000000e+00 : f32
    %243 = vector.broadcast %cst_55 : f32 to vector<8x128xf32>
    %244 = arith.addf %243, %242 : vector<8x128xf32>
    %245 = arith.divf %243, %244 : vector<8x128xf32>
    %246 = vector.extract_strided_slice %239 {offsets = [0, 128], sizes = [8, 128], strides = [1, 1]} : vector<8x512xf32> to vector<8x128xf32>
    %247 = arith.negf %246 : vector<8x128xf32>
    %248 = math.exp %247 : vector<8x128xf32>
    %cst_56 = arith.constant 1.000000e+00 : f32
    %249 = vector.broadcast %cst_56 : f32 to vector<8x128xf32>
    %250 = arith.addf %249, %248 : vector<8x128xf32>
    %251 = arith.divf %249, %250 : vector<8x128xf32>
    %252 = vector.extract_strided_slice %239 {offsets = [0, 256], sizes = [8, 128], strides = [1, 1]} : vector<8x512xf32> to vector<8x128xf32>
    %253 = math.tanh %252 : vector<8x128xf32>
    %254 = vector.extract_strided_slice %239 {offsets = [0, 384], sizes = [8, 128], strides = [1, 1]} : vector<8x512xf32> to vector<8x128xf32>
    %255 = arith.negf %254 : vector<8x128xf32>
    %256 = math.exp %255 : vector<8x128xf32>
    %cst_57 = arith.constant 1.000000e+00 : f32
    %257 = vector.broadcast %cst_57 : f32 to vector<8x128xf32>
    %258 = arith.addf %257, %256 : vector<8x128xf32>
    %259 = arith.divf %257, %258 : vector<8x128xf32>
    %260 = arith.mulf %251, %230 : vector<8x128xf32>
    %261 = arith.mulf %245, %253 : vector<8x128xf32>
    %262 = arith.addf %260, %261 : vector<8x128xf32>
    %263 = math.tanh %262 : vector<8x128xf32>
    %264 = arith.mulf %259, %263 : vector<8x128xf32>
    %265 = arith.truncf %264 : vector<8x128xf32> to vector<8x128xbf16>
    %c8_i32_58 = arith.constant 8 : i32
    %c56 = arith.constant 56 : index
    %c0_59 = arith.constant 0 : index
    %266 = vector.load %arg0[%c56, %c0_59] : memref<64x128xbf16, #tpu.memory_space<vmem>>, vector<8x128xbf16>
    %c0_60 = arith.constant 0 : index
    %c0_61 = arith.constant 0 : index
    %267 = vector.load %arg4[%c0_60, %c0_61] : memref<128x512xbf16, #tpu.memory_space<vmem>>, vector<128x512xbf16>
    %cst_62 = arith.constant dense<0.000000e+00> : vector<8x512xf32>
    %268 = tpu.matmul %266, %267, %cst_62 {dimension_numbers = #tpu.dot_dimension_numbers<[1], [0], [0], [1], [0, 0, 1, 1], [], []>} : vector<8x128xbf16>, vector<128x512xbf16>, vector<8x512xf32> -> vector<8x512xf32>
    %c0_63 = arith.constant 0 : index
    %c0_64 = arith.constant 0 : index
    %269 = vector.load %arg5[%c0_63, %c0_64] : memref<1x512xf32, #tpu.memory_space<vmem>>, vector<1x512xf32>
    %270 = vector.broadcast %269 : vector<1x512xf32> to vector<8x512xf32>
    %271 = arith.addf %268, %270 : vector<8x512xf32>
    %272 = vector.extract_strided_slice %271 {offsets = [0, 0], sizes = [8, 128], strides = [1, 1]} : vector<8x512xf32> to vector<8x128xf32>
    %273 = arith.negf %272 : vector<8x128xf32>
    %274 = math.exp %273 : vector<8x128xf32>
    %cst_65 = arith.constant 1.000000e+00 : f32
    %275 = vector.broadcast %cst_65 : f32 to vector<8x128xf32>
    %276 = arith.addf %275, %274 : vector<8x128xf32>
    %277 = arith.divf %275, %276 : vector<8x128xf32>
    %278 = vector.extract_strided_slice %271 {offsets = [0, 256], sizes = [8, 128], strides = [1, 1]} : vector<8x512xf32> to vector<8x128xf32>
    %279 = math.tanh %278 : vector<8x128xf32>
    %280 = vector.extract_strided_slice %271 {offsets = [0, 384], sizes = [8, 128], strides = [1, 1]} : vector<8x512xf32> to vector<8x128xf32>
    %281 = arith.negf %280 : vector<8x128xf32>
    %282 = math.exp %281 : vector<8x128xf32>
    %cst_66 = arith.constant 1.000000e+00 : f32
    %283 = vector.broadcast %cst_66 : f32 to vector<8x128xf32>
    %284 = arith.addf %283, %282 : vector<8x128xf32>
    %285 = arith.divf %283, %284 : vector<8x128xf32>
    %286 = arith.mulf %277, %279 : vector<8x128xf32>
    %287 = math.tanh %286 : vector<8x128xf32>
    %288 = arith.mulf %285, %287 : vector<8x128xf32>
    %c0_67 = arith.constant 0 : index
    %c0_68 = arith.constant 0 : index
    %289 = vector.load %arg6[%c0_67, %c0_68] : memref<8x256xbf16, #tpu.memory_space<vmem>>, vector<8x128xbf16>
    tpu.vector_store %arg6[%c0_67, %c0_68], %265 {strides = array<i32>} : memref<8x256xbf16, #tpu.memory_space<vmem>>, vector<8x128xbf16>,
    %290 = arith.truncf %288 : vector<8x128xf32> to vector<8x128xbf16>
    %c0_69 = arith.constant 0 : index
    %c128 = arith.constant 128 : index
    %291 = vector.load %arg6[%c0_69, %c128] : memref<8x256xbf16, #tpu.memory_space<vmem>>, vector<8x128xbf16>
    tpu.vector_store %arg6[%c0_69, %c128], %290 {strides = array<i32>} : memref<8x256xbf16, #tpu.memory_space<vmem>>, vector<8x128xbf16>,
    return
  }
}

</mosaic_0001>

<bundles_post_ra>
// kernel: tpu_custom_call.1
= control target key start
LH: loop header
LB: loop body
LE: loop exit
PB: predicated region body
PF: predicated region fallthrough
CT: control target
= control target key end

     0   :  { %11 = vsyncpa [#allocation4], 0  ;;  %s3353_s0 = inlined_call_operand.hbm [shape: bf16[64,128], index: 0, kind: input, shape index: {}]   ;;  %s3354_s1 = inlined_call_operand.hbm [shape: bf16[128,512], index: 1, kind: input, shape index: {}]   ;;  %s3355_s2 = inlined_call_operand.hbm [shape: bf16[128,512], index: 2, kind: input, shape index: {}]   ;;  %s3356_s3 = inlined_call_operand.hbm [shape: f32[1,512], index: 3, kind: input, shape index: {}]   ;;  %s3357_s4 = inlined_call_operand.hbm [shape: bf16[128,512], index: 4, kind: input, shape index: {}]   ;;  %s3358_s5 = inlined_call_operand.vmem [shape: f32[1,512], index: 5, kind: input, shape index: {}]   ;;  %s3359_s6 = inlined_call_operand.hbm [shape: bf16[8,256], index: 6, kind: output, shape index: {}]  }
   0x1   :  { %12 = vsyncpa [#allocation7], 0 }
   0x2   :  { %13 = vsyncpa [#allocation10], 0  ;;  %s32_s23 = sshll.u32 %s3354_s1, 4  ;;  %s33_s23 = int_to_ptr.hbm [resolvable:$true] %s32_s23 }
   0x3   :  { %14 = vsyncpa [#allocation5], 0  ;;  %s2764_s24 = smov [#allocation6]   ;;  %s59_s28 = sshll.u32 %s3356_s3, 4  ;;  %s60_s28 = int_to_ptr.hbm [resolvable:$true] %s59_s28 }
   0x4   :  { %s34_s25 = sshll.u32 %s2764_s24, 4  ;;  %s2765_s29 = smov 256   ;;  %s35_s25 = int_to_ptr.vmem [resolvable:$true] %s34_s25 }
   0x5   :  { %s2766_s30 = smov 16   ;;  %s2767_s7 = smov [#allocation9]  }
   0x6   :  { %40 = dma.hbm_to_vmem [thread:$0]  %s33_s23, 4096, %s35_s25, [#allocation7], %s2765_s29, %s2765_s29, %s2766_s30  }
   0x7   :  { %s61_s8 = sshll.u32 %s2767_s7, 4  ;;  %s19_s10 = sshll.u32 %s3353_s0, 4  ;;  %s62_s8 = int_to_ptr.vmem [resolvable:$true] %s61_s8  ;;  %s20_s10 = int_to_ptr.hbm [resolvable:$true] %s19_s10 }
   0x8   :  { %64 = dma.hbm_to_vmem [thread:$0]  %s60_s28, 64, %s62_s8, [#allocation10]  }
   0x9   :  { %s2768_s11 = smov [#allocation3]   ;;  %s45_s14 = sshll.u32 %s3355_s2, 4  ;;  %s46_s14 = int_to_ptr.hbm [resolvable:$true] %s45_s14 }
   0xa   :  { %s21_s12 = sshll.u32 %s2768_s11, 4  ;;  %s2769_s15 = smov 64   ;;  %s22_s12 = int_to_ptr.vmem [resolvable:$true] %s21_s12 }
   0xb   :  { %s2770_s16 = smov 4   ;;  %s2771_s17 = smov [#allocation8]  }
   0xc   :  { %27 = dma.hbm_to_vmem [thread:$0]  %s20_s10, 512, %s22_s12, [#allocation4], %s2769_s15, %s2769_s15, %s2770_s16  }
   0xd   :  { %s47_s18 = sshll.u32 %s2771_s17, 4  ;;  %s69_s0 = sshll.u32 %s3357_s4, 4  ;;  %s48_s18 = int_to_ptr.vmem [resolvable:$true] %s47_s18  ;;  %s70_s0 = int_to_ptr.hbm [resolvable:$true] %s69_s0 }
   0xe   :  { %53 = dma.hbm_to_vmem [thread:$0]  %s46_s14, 4096, %s48_s18, [#allocation7], %s2765_s29, %s2765_s29, %s2766_s30  }
   0xf   :  { %s2772_s21 = smov [#allocation11]  }
  0x10   :  { %s71_s22 = sshll.u32 %s2772_s21, 4  ;;  %s72_s22 = int_to_ptr.vmem [resolvable:$true] %s71_s22 }
  0x11   :  { %77 = dma.hbm_to_vmem [thread:$0]  %s70_s0, 4096, %s72_s22, [#allocation10], %s2765_s29, %s2765_s29, %s2766_s30  }
  0x12   :  { %2756 = dma.done.wait [#allocation4], 512  }
  0x13   :  { %2757 = vsyncadd [#allocation4], 4294966784 }
  0x14   :  { %2758 = dma.done.wait [#allocation7], 8192  }
  0x15   :  { %2759 = vsyncadd [#allocation7], 4294959104 }
  0x16   :  { %2760 = dma.done.wait [#allocation10], 4160  }
  0x17   :  { %2761 = vsyncadd [#allocation10], 4294963136  ;;  %v2100_v0 = vld [vmem:[#allocation6 + $0xe0] sm:$0xf]  ;;  %v2398_v1 = vld [vmem:[#allocation6 + $0xec] sm:$0xf0] }
  0x18   :  { %v2396_v2 = vld [vmem:[#allocation6 + $0xe4] sm:$0xf]  ;;  %v2101_v3 = vor.u32 %v2398_v1, %v2100_v0  ;;  %v2102_v4 = vld [vmem:[#allocation6 + $0xf0] sm:$0xf0]  ;;  %v2108_v5 = vld [vmem:[#allocation6 + $0xe8] sm:$0xf] }
  0x19   :  { %v2399_v6 = vld [vmem:[#allocation6 + $0xf4] sm:$0xf0]  ;;  %v2105_v7 = vor.u32 %v2396_v2, %v2102_v4  ;;  %v2397_v9 = vld [vmem:[#allocation6 + $0xec] sm:$0xf]  ;;  %v2110_v10 = vld [vmem:[#allocation6 + $0xf8] sm:$0xf0] }
  0x1a   :  { %v2109_v8 = vor.u32 %v2399_v6, %v2108_v5  ;;  %v2084_v11 = vld [vmem:[#allocation6 + $0xc0] sm:$0xf]  ;;  %335 = vmatpush.bf16.msra.mxu0 %v2101_v3  ;;  %v2113_v12 = vor.u32 %v2397_v9, %v2110_v10  ;;  %v2394_v13 = vld [vmem:[#allocation6 + $0xcc] sm:$0xf0]  ;;  %v2392_v14 = vld [vmem:[#allocation6 + $0xc4] sm:$0xf] }
  0x1b   :  { %v2086_v15 = vld [vmem:[#allocation6 + $0xd0] sm:$0xf0]  ;;  %364 = vmatpush.bf16.msra.mxu1 %v2105_v7  ;;  %v2085_v16 = vor.u32 %v2394_v13, %v2084_v11  ;;  %v2092_v18 = vld [vmem:[#allocation6 + $0xc8] sm:$0xf]  ;;  %v2395_v19 = vld [vmem:[#allocation6 + $0xd4] sm:$0xf0] }
  0x1c   :  { %393 = vmatpush.bf16.msra.mxu2 %v2109_v8  ;;  %v2089_v17 = vor.u32 %v2392_v14, %v2086_v15  ;;  %v2393_v20 = vld [vmem:[#allocation6 + $0xcc] sm:$0xf]  ;;  %422 = vmatpush.bf16.msra.mxu3 %v2113_v12  ;;  %v2093_v21 = vor.u32 %v2395_v19, %v2092_v18  ;;  %v2094_v22 = vld [vmem:[#allocation6 + $0xd8] sm:$0xf0]  ;;  %v2068_v23 = vld [vmem:[#allocation6 + $0xa0] sm:$0xf] }
  0x1d   :  { %v2390_v24 = vld [vmem:[#allocation6 + $0xac] sm:$0xf0]  ;;  %v2097_v25 = vor.u32 %v2393_v20, %v2094_v22  ;;  %v2388_v26 = vld [vmem:[#allocation6 + $0xa4] sm:$0xf]  ;;  %v2070_v27 = vld [vmem:[#allocation6 + $0xb0] sm:$0xf0] }
  0x1e   :  { %v2076_v28 = vld [vmem:[#allocation6 + $0xa8] sm:$0xf]  ;;  %336 = vmatpush.bf16.msra.mxu0 %v2085_v16  ;;  %v2069_v29 = vor.u32 %v2390_v24, %v2068_v23  ;;  %v2391_v30 = vld [vmem:[#allocation6 + $0xb4] sm:$0xf0]  ;;  %v2389_v31 = vld [vmem:[#allocation6 + $0xac] sm:$0xf]  ;;  %v2073_v33 = vor.u32 %v2388_v26, %v2070_v27 }
  0x1f   :  { %v2078_v32 = vld [vmem:[#allocation6 + $0xb8] sm:$0xf0]  ;;  %365 = vmatpush.bf16.msra.mxu1 %v2089_v17  ;;  %v2077_v34 = vor.u32 %v2391_v30, %v2076_v28  ;;  %v2052_v35 = vld [vmem:[#allocation6 + $0x80] sm:$0xf]  ;;  %v2386_v36 = vld [vmem:[#allocation6 + $0x8c] sm:$0xf0] }
  0x20   :  { %394 = vmatpush.bf16.msra.mxu2 %v2093_v21  ;;  %v2384_v37 = vld [vmem:[#allocation6 + $0x84] sm:$0xf]  ;;  %423 = vmatpush.bf16.msra.mxu3 %v2097_v25  ;;  %v2081_v38 = vor.u32 %v2389_v31, %v2078_v32  ;;  %v2054_v39 = vld [vmem:[#allocation6 + $0x90] sm:$0xf0]  ;;  %v2060_v40 = vld [vmem:[#allocation6 + $0x88] sm:$0xf]  ;;  %v2053_v44 = vor.u32 %v2386_v36, %v2052_v35 }
  0x21   :  { %v2387_v41 = vld [vmem:[#allocation6 + $0x94] sm:$0xf0]  ;;  %v2385_v42 = vld [vmem:[#allocation6 + $0x8c] sm:$0xf]  ;;  %v2062_v43 = vld [vmem:[#allocation6 + $0x98] sm:$0xf0]  ;;  %v2057_v45 = vor.u32 %v2384_v37, %v2054_v39 }
  0x22   :  { %337 = vmatpush.bf16.msra.mxu0 %v2069_v29  ;;  %v2061_v46 = vor.u32 %v2387_v41, %v2060_v40  ;;  %v2036_v47 = vld [vmem:[#allocation6 + $0x60] sm:$0xf]  ;;  %v2382_v48 = vld [vmem:[#allocation6 + $0x6c] sm:$0xf0]  ;;  %v2380_v49 = vld [vmem:[#allocation6 + $0x64] sm:$0xf]  ;;  %v2065_v50 = vor.u32 %v2385_v42, %v2062_v43 }
  0x23   :  { %366 = vmatpush.bf16.msra.mxu1 %v2073_v33  ;;  %v2038_v51 = vld [vmem:[#allocation6 + $0x70] sm:$0xf0]  ;;  %v2044_v52 = vld [vmem:[#allocation6 + $0x68] sm:$0xf]  ;;  %v2383_v53 = vld [vmem:[#allocation6 + $0x74] sm:$0xf0]  ;;  %v2037_v56 = vor.u32 %v2382_v48, %v2036_v47 }
  0x24   :  { %395 = vmatpush.bf16.msra.mxu2 %v2077_v34  ;;  %424 = vmatpush.bf16.msra.mxu3 %v2081_v38  ;;  %v2381_v54 = vld [vmem:[#allocation6 + $0x6c] sm:$0xf]  ;;  %v2046_v55 = vld [vmem:[#allocation6 + $0x78] sm:$0xf0]  ;;  %v2041_v57 = vor.u32 %v2380_v49, %v2038_v51  ;;  %v2045_v58 = vor.u32 %v2383_v53, %v2044_v52  ;;  %v2020_v59 = vld [vmem:[#allocation6 + $0x40] sm:$0xf] }
  0x25   :  { %v2378_v60 = vld [vmem:[#allocation6 + $0x4c] sm:$0xf0]  ;;  %v2376_v61 = vld [vmem:[#allocation6 + $0x44] sm:$0xf]  ;;  %v2049_v62 = vor.u32 %v2381_v54, %v2046_v55  ;;  %v2022_v63 = vld [vmem:[#allocation6 + $0x50] sm:$0xf0] }
  0x26   :  { %338 = vmatpush.bf16.msra.mxu0 %v2053_v44  ;;  %v2028_v0 = vld [vmem:[#allocation6 + $0x48] sm:$0xf]  ;;  %v2379_v1 = vld [vmem:[#allocation6 + $0x54] sm:$0xf0]  ;;  %v2377_v2 = vld [vmem:[#allocation6 + $0x4c] sm:$0xf]  ;;  %v2021_v4 = vor.u32 %v2378_v60, %v2020_v59  ;;  %v2025_v5 = vor.u32 %v2376_v61, %v2022_v63 }
  0x27   :  { %367 = vmatpush.bf16.msra.mxu1 %v2057_v45  ;;  %v2030_v3 = vld [vmem:[#allocation6 + $0x58] sm:$0xf0]  ;;  %v2029_v6 = vor.u32 %v2379_v1, %v2028_v0  ;;  %v2004_v7 = vld [vmem:[#allocation6 + $0x20] sm:$0xf]  ;;  %v2374_v8 = vld [vmem:[#allocation6 + $0x2c] sm:$0xf0] }
  0x28   :  { %396 = vmatpush.bf16.msra.mxu2 %v2061_v46  ;;  %425 = vmatpush.bf16.msra.mxu3 %v2065_v50  ;;  %v2372_v9 = vld [vmem:[#allocation6 + $0x24] sm:$0xf]  ;;  %v2033_v10 = vor.u32 %v2377_v2, %v2030_v3  ;;  %v2006_v11 = vld [vmem:[#allocation6 + $0x30] sm:$0xf0]  ;;  %v2012_v12 = vld [vmem:[#allocation6 + $0x28] sm:$0xf]  ;;  %v2005_v16 = vor.u32 %v2374_v8, %v2004_v7 }
  0x29   :  { %v2375_v13 = vld [vmem:[#allocation6 + $0x34] sm:$0xf0]  ;;  %v2373_v14 = vld [vmem:[#allocation6 + $0x2c] sm:$0xf]  ;;  %v2014_v15 = vld [vmem:[#allocation6 + $0x38] sm:$0xf0]  ;;  %v2009_v18 = vor.u32 %v2372_v9, %v2006_v11 }
  0x2a   :  { %339 = vmatpush.bf16.msra.mxu0 %v2037_v56  ;;  %v1988_v17 = vld [vmem:[#allocation6] sm:$0xf]  ;;  %v2013_v19 = vor.u32 %v2375_v13, %v2012_v12  ;;  %v2370_v20 = vld [vmem:[#allocation6 + $0xc] sm:$0xf0]  ;;  %v2368_v21 = vld [vmem:[#allocation6 + $0x4] sm:$0xf]  ;;  %v2017_v23 = vor.u32 %v2373_v14, %v2014_v15 }
  0x2b   :  { %368 = vmatpush.bf16.msra.mxu1 %v2041_v57  ;;  %v1990_v22 = vld [vmem:[#allocation6 + $0x10] sm:$0xf0]  ;;  %v1996_v24 = vld [vmem:[#allocation6 + $0x8] sm:$0xf]  ;;  %v2371_v25 = vld [vmem:[#allocation6 + $0x14] sm:$0xf0]  ;;  %v1989_v30 = vor.u32 %v2370_v20, %v1988_v17 }
  0x2c   :  { %397 = vmatpush.bf16.msra.mxu2 %v2045_v58  ;;  %426 = vmatpush.bf16.msra.mxu3 %v2049_v62  ;;  %v2369_v26 = vld [vmem:[#allocation6 + $0xc] sm:$0xf]  ;;  %v1998_v27 = vld [vmem:[#allocation6 + $0x18] sm:$0xf0]  ;;  %v2228_v28 = vld [vmem:[#allocation8 + $0xe0] sm:$0xf]  ;;  %v1993_v33 = vor.u32 %v2368_v21, %v1990_v22  ;;  %v1997_v34 = vor.u32 %v2371_v25, %v1996_v24 }
  0x2d   :  { %v2430_v29 = vld [vmem:[#allocation8 + $0xec] sm:$0xf0]  ;;  %v2428_v31 = vld [vmem:[#allocation8 + $0xe4] sm:$0xf]  ;;  %v2230_v32 = vld [vmem:[#allocation8 + $0xf0] sm:$0xf0]  ;;  %v2001_v36 = vor.u32 %v2369_v26, %v1998_v27 }
  0x2e   :  { %340 = vmatpush.bf16.msra.mxu0 %v2021_v4  ;;  %v2364_v35 = vld [vmem:[#allocation3] sm:$0xff]  ;;  %v2834_v37 = vor.u32 %v2430_v29, %v2228_v28  ;;  %v2429_v38 = vld [vmem:[#allocation8 + $0xec] sm:$0xf]  ;;  %v2236_v39 = vld [vmem:[#allocation8 + $0xe8] sm:$0xf]  ;;  %v2836_v41 = vor.u32 %v2428_v31, %v2230_v32  ;;  %s1951_s26 = sshll.u32 %s3359_s6, 4  ;;  %s1952_s26 = int_to_ptr.hbm [resolvable:$true] %s1951_s26 }
  0x2f   :  { %369 = vmatpush.bf16.msra.mxu1 %v2025_v5  ;;  %v2431_v40 = vld [vmem:[#allocation8 + $0xf4] sm:$0xf0]  ;;  %v2238_v42 = vld [vmem:[#allocation8 + $0xf8] sm:$0xf0]  ;;  %v2212_v43 = vld [vmem:[#allocation8 + $0xc0] sm:$0xf] }
  0x30   :  { %398 = vmatpush.bf16.msra.mxu2 %v2029_v6  ;;  %427 = vmatpush.bf16.msra.mxu3 %v2033_v10  ;;  %v2426_v44 = vld [vmem:[#allocation8 + $0xcc] sm:$0xf0]  ;;  %v2424_v45 = vld [vmem:[#allocation8 + $0xc4] sm:$0xf]  ;;  %v2214_v46 = vld [vmem:[#allocation8 + $0xd0] sm:$0xf0]  ;;  %v2838_v47 = vor.u32 %v2431_v40, %v2236_v39  ;;  %v2841_v48 = vor.u32 %v2429_v38, %v2238_v42 }
  0x31   :  { %v2843_v49 = vor.u32 %v2426_v44, %v2212_v43  ;;  %v2425_v50 = vld [vmem:[#allocation8 + $0xcc] sm:$0xf]  ;;  %v2220_v51 = vld [vmem:[#allocation8 + $0xc8] sm:$0xf]  ;;  %v2427_v52 = vld [vmem:[#allocation8 + $0xd4] sm:$0xf0]  ;;  %v2846_v53 = vor.u32 %v2424_v45, %v2214_v46 }
  0x32   :  { %341 = vmatpush.bf16.msra.mxu0 %v2005_v16  ;;  %v2222_v54 = vld [vmem:[#allocation8 + $0xd8] sm:$0xf0]  ;;  %v2196_v55 = vld [vmem:[#allocation8 + $0xa0] sm:$0xf]  ;;  %v2422_v56 = vld [vmem:[#allocation8 + $0xac] sm:$0xf0]  ;;  %v2849_v59 = vor.u32 %v2427_v52, %v2220_v51 }
  0x33   :  { %370 = vmatpush.bf16.msra.mxu1 %v2009_v18  ;;  %v2420_v57 = vld [vmem:[#allocation8 + $0xa4] sm:$0xf]  ;;  %v2198_v58 = vld [vmem:[#allocation8 + $0xb0] sm:$0xf0]  ;;  %v2853_v60 = vor.u32 %v2425_v50, %v2222_v54  ;;  %v2855_v61 = vor.u32 %v2422_v56, %v2196_v55  ;;  %v2421_v62 = vld [vmem:[#allocation8 + $0xac] sm:$0xf] }
  0x34   :  { %399 = vmatpush.bf16.msra.mxu2 %v2013_v19  ;;  %428 = vmatpush.bf16.msra.mxu3 %v2017_v23  ;;  %v2204_v63 = vld [vmem:[#allocation8 + $0xa8] sm:$0xf]  ;;  %v2423_v0 = vld [vmem:[#allocation8 + $0xb4] sm:$0xf0]  ;;  %v2858_v1 = vor.u32 %v2420_v57, %v2198_v58  ;;  %v2206_v2 = vld [vmem:[#allocation8 + $0xb8] sm:$0xf0] }
  0x35   :  { %v2180_v3 = vld [vmem:[#allocation8 + $0x80] sm:$0xf]  ;;  %v2418_v4 = vld [vmem:[#allocation8 + $0x8c] sm:$0xf0]  ;;  %v2416_v5 = vld [vmem:[#allocation8 + $0x84] sm:$0xf]  ;;  %v2861_v7 = vor.u32 %v2423_v0, %v2204_v63  ;;  %v2865_v8 = vor.u32 %v2421_v62, %v2206_v2 }
  0x36   :  { %342 = vmatpush.bf16.msra.mxu0 %v1989_v30  ;;  %v2182_v6 = vld [vmem:[#allocation8 + $0x90] sm:$0xf0]  ;;  %v2867_v9 = vor.u32 %v2418_v4, %v2180_v3  ;;  %v2417_v10 = vld [vmem:[#allocation8 + $0x8c] sm:$0xf]  ;;  %v2188_v11 = vld [vmem:[#allocation8 + $0x88] sm:$0xf] }
  0x37   :  { %371 = vmatpush.bf16.msra.mxu1 %v1993_v33  ;;  %v2419_v12 = vld [vmem:[#allocation8 + $0x94] sm:$0xf0]  ;;  %v2870_v13 = vor.u32 %v2416_v5, %v2182_v6  ;;  %v2190_v14 = vld [vmem:[#allocation8 + $0x98] sm:$0xf0]  ;;  %v2164_v15 = vld [vmem:[#allocation8 + $0x60] sm:$0xf] }
  0x38   :  { %400 = vmatpush.bf16.msra.mxu2 %v1997_v34  ;;  %429 = vmatpush.bf16.msra.mxu3 %v2001_v36  ;;  %v2414_v16 = vld [vmem:[#allocation8 + $0x6c] sm:$0xf0]  ;;  %v2412_v17 = vld [vmem:[#allocation8 + $0x64] sm:$0xf]  ;;  %v2166_v18 = vld [vmem:[#allocation8 + $0x70] sm:$0xf0]  ;;  %v2873_v20 = vor.u32 %v2419_v12, %v2188_v11  ;;  %v2877_v21 = vor.u32 %v2417_v10, %v2190_v14 }
  0x39   :  { %343 = vmatmul.bf16.vlgmr.msra.gmra.mxu0 %v2364_v35  ;;  %v2365_v19 = vld [vmem:[#allocation3 + $0x8] sm:$0xff]  ;;  %v2879_v22 = vor.u32 %v2414_v16, %v2164_v15  ;;  %v2415_v25 = vld [vmem:[#allocation8 + $0x74] sm:$0xf0]  ;;  %v2882_v26 = vor.u32 %v2412_v17, %v2166_v18  ;;  %v2174_v27 = vld [vmem:[#allocation8 + $0x78] sm:$0xf0]  ;;  %v2773_v18 = vmov 0  }
  0x3a   :  { %682 = vmatpush.bf16.msrb.mxu0 %v2834_v37  ;;  %372 = vmatmul.bf16.vlgmr.msra.gmra.mxu1 %v2364_v35  ;;  %v2413_v23 = vld [vmem:[#allocation8 + $0x6c] sm:$0xf]  ;;  %v2172_v24 = vld [vmem:[#allocation8 + $0x68] sm:$0xf]  ;;  %v2148_v28 = vld [vmem:[#allocation8 + $0x40] sm:$0xf] }
  0x3b   :  { %695 = vmatpush.bf16.msrb.mxu1 %v2836_v41  ;;  %401 = vmatmul.bf16.vlgmr.msra.gmra.mxu2 %v2364_v35  ;;  %v2410_v29 = vld [vmem:[#allocation8 + $0x4c] sm:$0xf0]  ;;  %v2408_v30 = vld [vmem:[#allocation8 + $0x44] sm:$0xf]  ;;  %v2150_v31 = vld [vmem:[#allocation8 + $0x50] sm:$0xf0]  ;;  %v2885_v32 = vor.u32 %v2415_v25, %v2172_v24  ;;  %v2889_v33 = vor.u32 %v2413_v23, %v2174_v27 }
  0x3c   :  { %430 = vmatmul.bf16.vlgmr.msra.gmra.mxu3 %v2364_v35  ;;  %708 = vmatpush.bf16.msrb.mxu2 %v2838_v47  ;;  %v2891_v34 = vor.u32 %v2410_v29, %v2148_v28  ;;  %v2894_v35 = vor.u32 %v2408_v30, %v2150_v31  ;;  %v2409_v36 = vld [vmem:[#allocation8 + $0x4c] sm:$0xf]  ;;  %v2158_v38 = vld [vmem:[#allocation8 + $0x58] sm:$0xf0]  ;;  %v2132_v39 = vld [vmem:[#allocation8 + $0x20] sm:$0xf] }
  0x3d   :  { %721 = vmatpush.bf16.msrb.mxu3 %v2841_v48  ;;  %v2406_v40 = vld [vmem:[#allocation8 + $0x2c] sm:$0xf0]  ;;  %v2404_v42 = vld [vmem:[#allocation8 + $0x24] sm:$0xf]  ;;  %v2899_v43 = vor.u32 %v2409_v36, %v2158_v38  ;;  %v2134_v45 = vld [vmem:[#allocation8 + $0x30] sm:$0xf0] }
  0x3e   :  { %683 = vmatpush.bf16.msrb.mxu0 %v2843_v49  ;;  %v2901_v44 = vor.u32 %v2406_v40, %v2132_v39  ;;  %v2156_v46 = vld [vmem:[#allocation8 + $0x48] sm:$0xf]  ;;  %v2411_v50 = vld [vmem:[#allocation8 + $0x54] sm:$0xf0]  ;;  %v2904_v51 = vor.u32 %v2404_v42, %v2134_v45  ;;  %v2405_v54 = vld [vmem:[#allocation8 + $0x2c] sm:$0xf] }
  0x3f   :  { %696 = vmatpush.bf16.msrb.mxu1 %v2846_v53  ;;  %v2906_v52 = vor.u32 %v2411_v50, %v2156_v46  ;;  %v2142_v55 = vld [vmem:[#allocation8 + $0x38] sm:$0xf0]  ;;  %v2116_v56 = vld [vmem:[#allocation8] sm:$0xf]  ;;  %v2402_v57 = vld [vmem:[#allocation8 + $0xc] sm:$0xf0] }
  0x40   :  { %709 = vmatpush.bf16.msrb.mxu2 %v2849_v59  ;;  %v2400_v58 = vld [vmem:[#allocation8 + $0x4] sm:$0xf]  ;;  %v2118_v62 = vld [vmem:[#allocation8 + $0x10] sm:$0xf0]  ;;  %v2140_v63 = vld [vmem:[#allocation8 + $0x28] sm:$0xf]  ;;  %v2911_v2 = vor.u32 %v2405_v54, %v2142_v55  ;;  %v2913_v3 = vor.u32 %v2402_v57, %v2116_v56 }
  0x41   :  { %722 = vmatpush.bf16.msrb.mxu3 %v2853_v60  ;;  %v2407_v0 = vld [vmem:[#allocation8 + $0x34] sm:$0xf0]  ;;  %v2124_v5 = vld [vmem:[#allocation8 + $0x8] sm:$0xf]  ;;  %v2918_v10 = vor.u32 %v2400_v58, %v2118_v62  ;;  %v2401_v11 = vld [vmem:[#allocation8 + $0xc] sm:$0xf] }
  0x42   :  { %684 = vmatpush.bf16.msrb.mxu0 %v2855_v61  ;;  %v2915_v4 = vor.u32 %v2407_v0, %v2140_v63  ;;  %v2403_v6 = vld [vmem:[#allocation8 + $0x14] sm:$0xf0]  ;;  %v2126_v12 = vld [vmem:[#allocation8 + $0x18] sm:$0xf0]  ;;  %v2366_v16 = vld [vmem:[#allocation3 + $0x10] sm:$0xff] }
  0x43   :  { %697 = vmatpush.bf16.msrb.mxu1 %v2858_v1  ;;  %v2921_v14 = vor.u32 %v2403_v6, %v2124_v5  ;;  %v2925_v15 = vor.u32 %v2401_v11, %v2126_v12  ;;  %v2367_v17 = vld [vmem:[#allocation3 + $0x18] sm:$0xff]  ;;  %v141_v29 = vld [vmem:[#allocation9] sm:$0xf] }
  0x44   :  { %710 = vmatpush.bf16.msrb.mxu2 %v2861_v7  ;;  %v3002_v30 = vperm.slane %v141_v29, 0  ;;  %v3004_v31 = vperm.slane %v141_v29, 3  ;;  %v3008_v38 = vperm.slane %v141_v29, 1  ;;  %v3019_v54 = vperm.slane %v141_v29, 2 }
  0x45   :  { %723 = vmatpush.bf16.msrb.mxu3 %v2865_v8 }
  0x46   :  { %685 = vmatpush.bf16.msrb.mxu0 %v2867_v9 }
  0x47   :  { %698 = vmatpush.bf16.msrb.mxu1 %v2870_v13 }
  0x48   :  { %711 = vmatpush.bf16.msrb.mxu2 %v2873_v20 }
  0x49   :  { %724 = vmatpush.bf16.msrb.mxu3 %v2877_v21  ;;  %348 = vmatmul.bf16.gmra.mxu0 %v2365_v19 }
  0x4a   :  { %686 = vmatpush.bf16.msrb.mxu0 %v2879_v22  ;;  %377 = vmatmul.bf16.gmra.mxu1 %v2365_v19 }
  0x4b   :  { %699 = vmatpush.bf16.msrb.mxu1 %v2882_v26  ;;  %406 = vmatmul.bf16.gmra.mxu2 %v2365_v19 }
  0x4c   :  { %435 = vmatmul.bf16.gmra.mxu3 %v2365_v19  ;;  %712 = vmatpush.bf16.msrb.mxu2 %v2885_v32 }
  0x4d   :  { %725 = vmatpush.bf16.msrb.mxu3 %v2889_v33 }
  0x4e   :  { %687 = vmatpush.bf16.msrb.mxu0 %v2891_v34 }
  0x4f   :  { %700 = vmatpush.bf16.msrb.mxu1 %v2894_v35 }
  0x50   :  { %713 = vmatpush.bf16.msrb.mxu2 %v2906_v52 }
  0x51   :  { %726 = vmatpush.bf16.msrb.mxu3 %v2899_v43 }
  0x52   :  { %688 = vmatpush.bf16.msrb.mxu0 %v2901_v44 }
  0x53   :  { %701 = vmatpush.bf16.msrb.mxu1 %v2904_v51 }
  0x54   :  { %714 = vmatpush.bf16.msrb.mxu2 %v2915_v4 }
  0x55   :  { %727 = vmatpush.bf16.msrb.mxu3 %v2911_v2 }
  0x56   :  { %689 = vmatpush.bf16.msrb.mxu0 %v2913_v3 }
  0x57   :  { %702 = vmatpush.bf16.msrb.mxu1 %v2918_v10 }
  0x58   :  { %715 = vmatpush.bf16.msrb.mxu2 %v2921_v14 }
  0x59   :  { %728 = vmatpush.bf16.msrb.mxu3 %v2925_v15  ;;  %353 = vmatmul.bf16.gmra.mxu0 %v2366_v16 }
  0x5a   :  { %809 = vmatpush.bf16.msra.mxu0 %v2834_v37  ;;  %382 = vmatmul.bf16.gmra.mxu1 %v2366_v16 }
  0x5b   :  { %822 = vmatpush.bf16.msra.mxu1 %v2836_v41  ;;  %411 = vmatmul.bf16.gmra.mxu2 %v2366_v16 }
  0x5c   :  { %835 = vmatpush.bf16.msra.mxu2 %v2838_v47  ;;  %440 = vmatmul.bf16.gmra.mxu3 %v2366_v16 }
  0x5d   :  { %848 = vmatpush.bf16.msra.mxu3 %v2841_v48 }
  0x5e   :  { %810 = vmatpush.bf16.msra.mxu0 %v2843_v49 }
  0x5f   :  { %823 = vmatpush.bf16.msra.mxu1 %v2846_v53 }
  0x60   :  { %836 = vmatpush.bf16.msra.mxu2 %v2849_v59 }
  0x61   :  { %849 = vmatpush.bf16.msra.mxu3 %v2853_v60 }
  0x62   :  { %811 = vmatpush.bf16.msra.mxu0 %v2855_v61 }
  0x63   :  { %824 = vmatpush.bf16.msra.mxu1 %v2858_v1 }
  0x64   :  { %837 = vmatpush.bf16.msra.mxu2 %v2861_v7 }
  0x65   :  { %850 = vmatpush.bf16.msra.mxu3 %v2865_v8 }
  0x66   :  { %812 = vmatpush.bf16.msra.mxu0 %v2867_v9 }
  0x67   :  { %825 = vmatpush.bf16.msra.mxu1 %v2870_v13 }
  0x68   :  { %838 = vmatpush.bf16.msra.mxu2 %v2873_v20 }
  0x69   :  { %851 = vmatpush.bf16.msra.mxu3 %v2877_v21  ;;  %358 = vmatmul.bf16.gmra.mxu0 %v2367_v17 }
  0x6a   :  { %813 = vmatpush.bf16.msra.mxu0 %v2879_v22  ;;  %387 = vmatmul.bf16.gmra.mxu1 %v2367_v17 }
  0x6b   :  { %826 = vmatpush.bf16.msra.mxu1 %v2882_v26  ;;  %416 = vmatmul.bf16.gmra.mxu2 %v2367_v17 }
  0x6c   :  { %839 = vmatpush.bf16.msra.mxu2 %v2885_v32  ;;  %445 = vmatmul.bf16.gmra.mxu3 %v2367_v17 }
  0x6d   :  { %852 = vmatpush.bf16.msra.mxu3 %v2889_v33 }
  0x6e   :  { %814 = vmatpush.bf16.msra.mxu0 %v2891_v34 }
  0x6f   :  { %827 = vmatpush.bf16.msra.mxu1 %v2894_v35 }
  0x70   :  { %840 = vmatpush.bf16.msra.mxu2 %v2906_v52 }
  0x71   :  { %853 = vmatpush.bf16.msra.mxu3 %v2899_v43 }
  0x72   :  { %815 = vmatpush.bf16.msra.mxu0 %v2901_v44 }
  0x73   :  { %828 = vmatpush.bf16.msra.mxu1 %v2904_v51 }
  0x74   :  { %841 = vmatpush.bf16.msra.mxu2 %v2915_v4 }
  0x75   :  { %854 = vmatpush.bf16.msra.mxu3 %v2911_v2 }
  0x76   :  { %816 = vmatpush.bf16.msra.mxu0 %v2913_v3 }
  0x77   :  { %829 = vmatpush.bf16.msra.mxu1 %v2918_v10 }
  0x78   :  { %842 = vmatpush.bf16.msra.mxu2 %v2921_v14 }
  0x79   :  { %855 = vmatpush.bf16.msra.mxu3 %v2925_v15  ;;  %690 = vmatmul.bf16.vlgmr.msrb.gmra.mxu0 %v2773_v18 }
  0x7a   :  { %703 = vmatmul.bf16.vlgmr.msrb.gmra.mxu1 %v2773_v18  ;;  %936 = vmatpush.bf16.msrb.mxu0 %v2834_v37 }
  0x7b   :  { %716 = vmatmul.bf16.vlgmr.msrb.gmra.mxu2 %v2773_v18  ;;  %949 = vmatpush.bf16.msrb.mxu1 %v2836_v41 }
  0x7c   :  { %729 = vmatmul.bf16.vlgmr.msrb.gmra.mxu3 %v2773_v18  ;;  %962 = vmatpush.bf16.msrb.mxu2 %v2838_v47 }
  0x7d   :  { %975 = vmatpush.bf16.msrb.mxu3 %v2841_v48 }
  0x7e   :  { %937 = vmatpush.bf16.msrb.mxu0 %v2843_v49 }
  0x7f   :  { %950 = vmatpush.bf16.msrb.mxu1 %v2846_v53 }
  0x80   :  { %963 = vmatpush.bf16.msrb.mxu2 %v2849_v59 }
  0x81   :  { %976 = vmatpush.bf16.msrb.mxu3 %v2853_v60 }
  0x82   :  { %938 = vmatpush.bf16.msrb.mxu0 %v2855_v61 }
  0x83   :  { %951 = vmatpush.bf16.msrb.mxu1 %v2858_v1 }
  0x84   :  { %964 = vmatpush.bf16.msrb.mxu2 %v2861_v7 }
  0x85   :  { %977 = vmatpush.bf16.msrb.mxu3 %v2865_v8 }
  0x86   :  { %939 = vmatpush.bf16.msrb.mxu0 %v2867_v9 }
  0x87   :  { %952 = vmatpush.bf16.msrb.mxu1 %v2870_v13 }
  0x88   :  { %965 = vmatpush.bf16.msrb.mxu2 %v2873_v20 }
  0x89   :  { %978 = vmatpush.bf16.msrb.mxu3 %v2877_v21 }
  0x8a   :  { %940 = vmatpush.bf16.msrb.mxu0 %v2879_v22 }
  0x8b   :  { %953 = vmatpush.bf16.msrb.mxu1 %v2882_v26 }
  0x8c   :  { %966 = vmatpush.bf16.msrb.mxu2 %v2885_v32 }
  0x8d   :  { %979 = vmatpush.bf16.msrb.mxu3 %v2889_v33 }
  0x8e   :  { %941 = vmatpush.bf16.msrb.mxu0 %v2891_v34 }
  0x8f   :  { %954 = vmatpush.bf16.msrb.mxu1 %v2894_v35 }
  0x90   :  { %967 = vmatpush.bf16.msrb.mxu2 %v2906_v52 }
  0x91   :  { %980 = vmatpush.bf16.msrb.mxu3 %v2899_v43 }
  0x92   :  { %942 = vmatpush.bf16.msrb.mxu0 %v2901_v44 }
  0x93   :  { %955 = vmatpush.bf16.msrb.mxu1 %v2904_v51 }
  0x94   :  { %968 = vmatpush.bf16.msrb.mxu2 %v2915_v4 }
  0x95   :  { %981 = vmatpush.bf16.msrb.mxu3 %v2911_v2 }
  0x96   :  { %943 = vmatpush.bf16.msrb.mxu0 %v2913_v3 }
  0x97   :  { %956 = vmatpush.bf16.msrb.mxu1 %v2918_v10 }
  0x98   :  { %969 = vmatpush.bf16.msrb.mxu2 %v2921_v14 }
  0x99   :  { %982 = vmatpush.bf16.msrb.mxu3 %v2925_v15 }
  0xb6   :  { %v344_v19 = vpop.f32.mrf.mxu0 }
  0xb7   :  { %v373_v23 = vpop.f32.mrf.mxu1 }
  0xbe   :  { %v2994_v24 = vpop.f32.mrf.mxu2  ;;  %v2998_v27 = vpop.f32.mrf.mxu0 }
  0xbf   :  { %v2996_v25 = vpop.f32.mrf.mxu3  ;;  %v3000_v28 = vpop.f32.mrf.mxu1 }
  0xc6   :  { %v3006_v36 = vpop.f32.mrf.mxu2  ;;  %v349_v40 = vpop.f32.mrf.mxu0 }
  0xc7   :  { %v433_v39 = vpop.f32.mrf.mxu3  ;;  %v3014_v45 = vadd.f32 %v349_v40, %v3002_v30  ;;  %v378_v46 = vpop.f32.mrf.mxu1 }
  0xc8   :  { %v3011_v42 = vadd.f32 %v433_v39, %v3004_v31  ;;  %v3017_v50 = vadd.f32 %v378_v46, %v3008_v38 }
  0xc9   :  { %3360 = vst [vmem:[#allocation17_spill] sm:$0xff] %v3014_v45 }
  0xca   :  { %3361 = vst [vmem:[#allocation18_spill] sm:$0xff] %v3017_v50 }
  0xce   :  { %v407_v55 = vpop.f32.mrf.mxu2  ;;  %v351_v58 = vpop.f32.mrf.mxu0 }
  0xcf   :  { %v3022_v56 = vadd.f32 %v407_v55, %v3019_v54  ;;  %v436_v57 = vpop.f32.mrf.mxu3  ;;  %v3028_v63 = vadd.f32 %v351_v58, %v3002_v30  ;;  %v380_v0 = vpop.f32.mrf.mxu1 }
  0xd0   :  { %v3025_v62 = vadd.f32 %v436_v57, %v3004_v31  ;;  %v3031_v5 = vadd.f32 %v380_v0, %v3008_v38 }
  0xd1   :  { %3362 = vst [vmem:[#allocation19_spill] sm:$0xff] %v3022_v56 }
  0xd2   :  { %3363 = vst [vmem:[#allocation20_spill] sm:$0xff] %v3025_v62 }
  0xd3   :  { %3364 = vst [vmem:[#allocation21_spill] sm:$0xff] %v3028_v63 }
  0xd4   :  { %3365 = vst [vmem:[#allocation22_spill] sm:$0xff] %v3031_v5 }
  0xd6   :  { %v409_v6 = vpop.f32.mrf.mxu2  ;;  %v354_v16 = vpop.f32.mrf.mxu0 }
  0xd7   :  { %v3034_v11 = vadd.f32 %v409_v6, %v3019_v54  ;;  %v438_v12 = vpop.f32.mrf.mxu3  ;;  %v3040_v18 = vadd.f32 %v354_v16, %v3002_v30  ;;  %v383_v29 = vpop.f32.mrf.mxu1 }
  0xd8   :  { %v3037_v17 = vadd.f32 %v438_v12, %v3004_v31  ;;  %v3043_v39 = vadd.f32 %v383_v29, %v3008_v38 }
  0xd9   :  { %3366 = vst [vmem:[#allocation23_spill] sm:$0xff] %v3034_v11 }
  0xda   :  { %3367 = vst [vmem:[#allocation24_spill] sm:$0xff] %v3037_v17 }
  0xdb   :  { %3368 = vst [vmem:[#allocation25_spill] sm:$0xff] %v3040_v18 }
  0xdc   :  { %3369 = vst [vmem:[#allocation26_spill] sm:$0xff] %v3043_v39 }
  0xde   :  { %v412_v40 = vpop.f32.mrf.mxu2  ;;  %v356_v57 = vpop.f32.mrf.mxu0 }
  0xdf   :  { %v3046_v46 = vadd.f32 %v412_v40, %v3019_v54  ;;  %v441_v55 = vpop.f32.mrf.mxu3  ;;  %v3052_v0 = vadd.f32 %v356_v57, %v3002_v30  ;;  %v385_v6 = vpop.f32.mrf.mxu1 }
  0xe0   :  { %v3049_v58 = vadd.f32 %v441_v55, %v3004_v31  ;;  %v3055_v12 = vadd.f32 %v385_v6, %v3008_v38 }
  0xe1   :  { %3370 = vst [vmem:[#allocation27_spill] sm:$0xff] %v3046_v46 }
  0xe2   :  { %3371 = vst [vmem:[#allocation28_spill] sm:$0xff] %v3049_v58 }
  0xe3   :  { %3372 = vst [vmem:[#allocation29_spill] sm:$0xff] %v3052_v0 }
  0xe4   :  { %3373 = vst [vmem:[#allocation30_spill] sm:$0xff] %v3055_v12 }
  0xe6   :  { %v414_v16 = vpop.f32.mrf.mxu2  ;;  %v359_v18 = vpop.f32.mrf.mxu0 }
  0xe7   :  { %v3058_v29 = vadd.f32 %v414_v16, %v3019_v54  ;;  %v443_v39 = vpop.f32.mrf.mxu3  ;;  %v3064_v46 = vadd.f32 %v359_v18, %v3002_v30  ;;  %v388_v55 = vpop.f32.mrf.mxu1 }
  0xe8   :  { %v3061_v40 = vadd.f32 %v443_v39, %v3004_v31  ;;  %v3067_v57 = vadd.f32 %v388_v55, %v3008_v38 }
  0xe9   :  { %3374 = vst [vmem:[#allocation31_spill] sm:$0xff] %v3058_v29 }
  0xea   :  { %3375 = vst [vmem:[#allocation32_spill] sm:$0xff] %v3061_v40 }
  0xeb   :  { %3376 = vst [vmem:[#allocation33_spill] sm:$0xff] %v3064_v46  ;;  %v345_v46 = vadd.f32 %v344_v19, %v3002_v30  ;;  %v432_v19 = vadd.f32 %v2996_v25, %v3004_v31 }
  0xec   :  { %3377 = vst [vmem:[#allocation34_spill] sm:$0xff] %v3067_v57  ;;  %v374_v57 = vadd.f32 %v373_v23, %v3008_v38 }
  0xee   :  { %v417_v0 = vpop.f32.mrf.mxu2  ;;  %v361_v58 = vpop.f32.mrf.mxu0 }
  0xef   :  { %v3070_v6 = vadd.f32 %v417_v0, %v3019_v54  ;;  %v446_v12 = vpop.f32.mrf.mxu3  ;;  %v3076_v29 = vadd.f32 %v361_v58, %v3002_v30  ;;  %v390_v39 = vpop.f32.mrf.mxu1 }
  0xf0   :  { %v3073_v16 = vadd.f32 %v446_v12, %v3004_v31  ;;  %v3079_v18 = vadd.f32 %v390_v39, %v3008_v38 }
  0xf1   :  { %3378 = vst [vmem:[#allocation35_spill] sm:$0xff] %v3070_v6 }
  0xf2   :  { %3379 = vst [vmem:[#allocation36_spill] sm:$0xff] %v3073_v16 }
  0xf3   :  { %3380 = vst [vmem:[#allocation37_spill] sm:$0xff] %v3076_v29 }
  0xf4   :  { %3381 = vst [vmem:[#allocation38_spill] sm:$0xff] %v3079_v18 }
  0xf6   :  { %v419_v55 = vpop.f32.mrf.mxu2  ;;  %v691_v40 = vpop.f32.mrf.mxu0 }
  0xf7   :  { %v3084_v0 = vadd.f32 %v419_v55, %v3019_v54  ;;  %v448_v6 = vpop.f32.mrf.mxu3  ;;  %v734_v16 = vadd.f32 %v691_v40, %v345_v46  ;;  %v704_v58 = vpop.f32.mrf.mxu1 }
  0xf8   :  { %v3087_v12 = vadd.f32 %v448_v6, %v3004_v31  ;;  %v735_v29 = vadd.f32 %v704_v58, %v374_v57 }
  0xf9   :  { %3382 = vst [vmem:[#allocation39_spill] sm:$0xff] %v3084_v0  ;;  %v2242_v11 = vmul.f32 -1.442695, %v734_v16 }
  0xfa   :  { %3383 = vst [vmem:[#allocation40_spill] sm:$0xff] %v3087_v12  ;;  %v2243_v17 = vmul.f32 -1.442695, %v735_v29 }
  0xfb   :  { %2472 = vpow2.f32 %v2242_v11  ;;  %v403_v11 = vadd.f32 %v2994_v24, %v3019_v54 }
  0xfc   :  { %2474 = vpow2.f32 %v2243_v17 }
  0xfe   :  { %v717_v39 = vpop.f32.mrf.mxu2  ;;  %v693_v18 = vpop.f32.mrf.mxu0 }
  0xff   :  { %v730_v23 = vpop.f32.mrf.mxu3  ;;  %v706_v0 = vpop.f32.mrf.mxu1  ;;  %v736_v31 = vadd.f32 %v717_v39, %v403_v11 }
 0x100   :  { %v737_v55 = vadd.f32 %v730_v23, %v432_v19 }
 0x101   :  { %v2473_v5 = vpop.eup %2472 }
 0x102   :  { %v2244_v63 = vmul.f32 -1.442695, %v737_v55  ;;  %v2475_v56 = vpop.eup %2474  ;;  %v741_v6 = vadd.f32 1.0, %v2473_v5 }
 0x103   :  { %v760_v12 = vadd.f32 1.0, %v2475_v56 }
 0x104   :  { %2476 = vpow2.f32 %v2244_v63  ;;  %v753_v5 = vand.u32 2147483648, %v741_v6  ;;  %v751_v19 = vand.u32 2147483647, %v741_v6  ;;  %vm747_vm2 = vweird.f32 %v741_v6 }
 0x105   :  { %2478 = vrcp.f32 %v741_v6  ;;  %v772_v56 = vand.u32 2147483648, %v760_v12  ;;  %v770_v55 = vand.u32 2147483647, %v760_v12  ;;  %vm766_vm3 = vweird.f32 %v760_v12 }
 0x106   :  { %2480 = vrcp.f32 %v760_v12  ;;  %v719_v46 = vpop.f32.mrf.mxu2  ;;  %v754_v39 = vor.u32 1.1754944e-38, %v753_v5  ;;  %vm752_vm5 = vcmp.eq.f32.partialorder %v751_v19, 8.507059e+37 }
 0x107   :  { %v732_v29 = vpop.f32.mrf.mxu3  ;;  %v773_v11 = vor.u32 1.1754944e-38, %v772_v56  ;;  %vm771_vm7 = vcmp.eq.f32.partialorder %v770_v55, 8.507059e+37 }
 0x10a   :  { %v2477_v17 = vpop.eup %2476 }
 0x10b   :  { %v2479_v25 = vpop.eup %2478  ;;  %v780_v40 = vadd.f32 1.0, %v2477_v17 }
 0x10c   :  { %v2481_v57 = vpop.eup %2480  ;;  %v743_v16 = vmul.f32 %v2479_v25, %v741_v6  ;;  %vm748_vm0 = vweird.f32 %v2479_v25 }
 0x10d   :  { %v762_v18 = vmul.f32 %v2481_v57, %v760_v12  ;;  %2482 = vrcp.f32 %v780_v40  ;;  %vm767_vm1 = vweird.f32 %v2481_v57  ;;  %vm749_vm4 = vmor %vm747_vm2, %vm748_vm0  ;;  %v792_v5 = vand.u32 2147483648, %v780_v40 }
 0x10e   :  { %v744_v0 = vsub.f32 1.0, %v743_v16  ;;  %2484 = vtanh.f32 %v736_v31  ;;  %vm768_vm6 = vmor %vm766_vm3, %vm767_vm1  ;;  %vm786_vm9 = vweird.f32 %v780_v40 }
 0x10f   :  { %v763_v58 = vsub.f32 1.0, %v762_v18  ;;  %v793_v19 = vor.u32 1.1754944e-38, %v792_v5 }
 0x110   :  { %v745_v63 = vmul.f32 %v2479_v25, %v744_v0 }
 0x111   :  { %v764_v23 = vmul.f32 %v2481_v57, %v763_v58 }
 0x112   :  { %v746_v24 = vadd.f32 %v2479_v25, %v745_v63 }
 0x113   :  { %v2483_v46 = vpop.eup %2482  ;;  %v765_v29 = vadd.f32 %v2481_v57, %v764_v23 }
 0x114   :  { %v750_v17 = vsel %vm749_vm4, %v2479_v25, %v746_v24  ;;  %v782_v16 = vmul.f32 %v2483_v46, %v780_v40  ;;  %v2485_v31 = vpop.eup %2484  ;;  %vm787_vm8 = vweird.f32 %v2483_v46  ;;  %v790_v25 = vand.u32 2147483647, %v780_v40 }
 0x115   :  { %v755_v18 = vsel %vm752_vm5, %v754_v39, %v750_v17  ;;  %v769_v0 = vsel %vm768_vm6, %v2481_v57, %v765_v29  ;;  %vm788_vm10 = vmor %vm786_vm9, %vm787_vm8 }
 0x116   :  { %v774_v62 = vsel %vm771_vm7, %v773_v11, %v769_v0  ;;  %v797_v58 = vmul.f32 %v2485_v31, %v755_v18  ;;  %v783_v50 = vsub.f32 1.0, %v782_v16  ;;  %vm791_vm11 = vcmp.eq.f32.partialorder %v790_v25, 8.507059e+37 }
 0x117   :  { %v796_v45 = vmul.f32 0.0, %v774_v62  ;;  %v405_v25 = vadd.f32 %v3006_v36, %v3019_v54 }
 0x118   :  { %v784_v63 = vmul.f32 %v2483_v46, %v783_v50  ;;  %v376_v50 = vadd.f32 %v3000_v28, %v3008_v38 }
 0x119   :  { %v3093_v6 = vadd.f32 %v797_v58, %v796_v45  ;;  %v347_v45 = vadd.f32 %v2998_v27, %v3002_v30 }
 0x11a   :  { %v785_v12 = vadd.f32 %v2483_v46, %v784_v63 }
 0x11b   :  { %2486 = vtanh.f32 %v3093_v6 }
 0x11c   :  { %v789_v56 = vsel %vm788_vm10, %v2483_v46, %v785_v12 }
 0x11d   :  { %v794_v23 = vsel %vm791_vm11, %v793_v19, %v789_v56 }
 0x121   :  { %v2487_v57 = vpop.eup %2486 }
 0x122   :  { %v800_v55 = vmul.f32 %v2487_v57, %v794_v23 }
 0x124   :  { %v801_v24 = vpack.c.bf16 %v800_v55, %v800_v55 }
 0x126   :  { %817 = vmatmul.bf16.vlgmr.msra.gmra.mxu0 %v801_v24  ;;  %830 = vmatmul.bf16.vlgmr.msra.gmra.mxu1 %v801_v24 }
 0x127   :  { %843 = vmatmul.bf16.vlgmr.msra.gmra.mxu2 %v801_v24  ;;  %856 = vmatmul.bf16.vlgmr.msra.gmra.mxu3 %v801_v24 }
 0x128   :  { %1063 = vmatpush.bf16.msra.mxu0 %v2834_v37  ;;  %1076 = vmatpush.bf16.msra.mxu1 %v2836_v41 }
 0x129   :  { %1089 = vmatpush.bf16.msra.mxu2 %v2838_v47  ;;  %1102 = vmatpush.bf16.msra.mxu3 %v2841_v48 }
 0x12c   :  { %1064 = vmatpush.bf16.msra.mxu0 %v2843_v49  ;;  %1077 = vmatpush.bf16.msra.mxu1 %v2846_v53 }
 0x12d   :  { %1090 = vmatpush.bf16.msra.mxu2 %v2849_v59  ;;  %1103 = vmatpush.bf16.msra.mxu3 %v2853_v60 }
 0x130   :  { %1065 = vmatpush.bf16.msra.mxu0 %v2855_v61  ;;  %1078 = vmatpush.bf16.msra.mxu1 %v2858_v1 }
 0x131   :  { %1091 = vmatpush.bf16.msra.mxu2 %v2861_v7  ;;  %1104 = vmatpush.bf16.msra.mxu3 %v2865_v8 }
 0x134   :  { %1066 = vmatpush.bf16.msra.mxu0 %v2867_v9  ;;  %1079 = vmatpush.bf16.msra.mxu1 %v2870_v13 }
 0x135   :  { %1092 = vmatpush.bf16.msra.mxu2 %v2873_v20  ;;  %1105 = vmatpush.bf16.msra.mxu3 %v2877_v21 }
 0x138   :  { %1067 = vmatpush.bf16.msra.mxu0 %v2879_v22  ;;  %1080 = vmatpush.bf16.msra.mxu1 %v2882_v26 }
 0x139   :  { %1093 = vmatpush.bf16.msra.mxu2 %v2885_v32  ;;  %1106 = vmatpush.bf16.msra.mxu3 %v2889_v33 }
 0x13c   :  { %1068 = vmatpush.bf16.msra.mxu0 %v2891_v34  ;;  %1081 = vmatpush.bf16.msra.mxu1 %v2894_v35 }
 0x13d   :  { %1094 = vmatpush.bf16.msra.mxu2 %v2906_v52  ;;  %1107 = vmatpush.bf16.msra.mxu3 %v2899_v43 }
 0x140   :  { %1069 = vmatpush.bf16.msra.mxu0 %v2901_v44  ;;  %1082 = vmatpush.bf16.msra.mxu1 %v2904_v51 }
 0x141   :  { %1095 = vmatpush.bf16.msra.mxu2 %v2915_v4  ;;  %1108 = vmatpush.bf16.msra.mxu3 %v2911_v2 }
 0x144   :  { %1070 = vmatpush.bf16.msra.mxu0 %v2913_v3  ;;  %1083 = vmatpush.bf16.msra.mxu1 %v2918_v10 }
 0x145   :  { %1096 = vmatpush.bf16.msra.mxu2 %v2921_v14  ;;  %1109 = vmatpush.bf16.msra.mxu3 %v2925_v15 }
 0x1a3   :  { %v818_v62 = vpop.f32.mrf.mxu0  ;;  %v831_v40 = vpop.f32.mrf.mxu1 }
 0x1a4   :  { %v861_v46 = vadd.f32 %v818_v62, %v347_v45  ;;  %v862_v39 = vadd.f32 %v831_v40, %v376_v50 }
 0x1a6   :  { %v2245_v29 = vmul.f32 -1.442695, %v861_v46  ;;  %v2246_v11 = vmul.f32 -1.442695, %v862_v39 }
 0x1a8   :  { %2488 = vpow2.f32 %v2245_v29 }
 0x1a9   :  { %2490 = vpow2.f32 %v2246_v11 }
 0x1aa   :  { %v844_v17 = vpop.f32.mrf.mxu2  ;;  %v857_v16 = vpop.f32.mrf.mxu3 }
 0x1ab   :  { %v864_v31 = vadd.f32 %v857_v16, %v3011_v42  ;;  %v820_v18 = vpop.f32.mrf.mxu0  ;;  %v833_v0 = vpop.f32.mrf.mxu1  ;;  %v863_v57 = vadd.f32 %v844_v17, %v405_v25 }
 0x1ad   :  { %v2247_v58 = vmul.f32 -1.442695, %v864_v31 }
 0x1ae   :  { %v2489_v63 = vpop.eup %2488 }
 0x1af   :  { %v2491_v27 = vpop.eup %2490  ;;  %v868_v30 = vadd.f32 1.0, %v2489_v63  ;;  %2492 = vpow2.f32 %v2247_v58 }
 0x1b0   :  { %v887_v28 = vadd.f32 1.0, %v2491_v27 }
 0x1b1   :  { %2494 = vrcp.f32 %v868_v30  ;;  %v880_v50 = vand.u32 2147483648, %v868_v30  ;;  %v878_v46 = vand.u32 2147483647, %v868_v30  ;;  %vm874_vm14 = vweird.f32 %v868_v30 }
 0x1b2   :  { %2496 = vrcp.f32 %v887_v28  ;;  %v846_v38 = vpop.f32.mrf.mxu2  ;;  %v859_v12 = vpop.f32.mrf.mxu3  ;;  %v899_v62 = vand.u32 2147483648, %v887_v28  ;;  %v897_v29 = vand.u32 2147483647, %v887_v28  ;;  %vm893_vm15 = vweird.f32 %v887_v28 }
 0x1b3   :  { %v881_v54 = vor.u32 1.1754944e-38, %v880_v50  ;;  %vm879_vm2 = vcmp.eq.f32.partialorder %v878_v46, 8.507059e+37  ;;  %v3385_v46 = vld [vmem:[#allocation18_spill] sm:$0xff] }
 0x1b4   :  { %v900_v31 = vor.u32 1.1754944e-38, %v899_v62  ;;  %vm898_vm3 = vcmp.eq.f32.partialorder %v897_v29, 8.507059e+37  ;;  %v3384_v62 = vld [vmem:[#allocation17_spill] sm:$0xff] }
 0x1b5   :  { %v2493_v5 = vpop.eup %2492 }
 0x1b6   :  { %v907_v56 = vadd.f32 1.0, %v2493_v5 }
 0x1b7   :  { %v2495_v19 = vpop.eup %2494 }
 0x1b8   :  { %v2497_v42 = vpop.eup %2496  ;;  %v870_v23 = vmul.f32 %v2495_v19, %v868_v30  ;;  %2498 = vrcp.f32 %v907_v56  ;;  %vm875_vm12 = vweird.f32 %v2495_v19  ;;  %vm913_vm5 = vweird.f32 %v907_v56 }
 0x1b9   :  { %v889_v55 = vmul.f32 %v2497_v42, %v887_v28  ;;  %2500 = vtanh.f32 %v863_v57  ;;  %vm894_vm13 = vweird.f32 %v2497_v42  ;;  %vm876_vm0 = vmor %vm874_vm14, %vm875_vm12  ;;  %v919_v57 = vand.u32 2147483648, %v907_v56 }
 0x1ba   :  { %v871_v24 = vsub.f32 1.0, %v870_v23  ;;  %vm895_vm1 = vmor %vm893_vm15, %vm894_vm13 }
 0x1bb   :  { %v890_v45 = vsub.f32 1.0, %v889_v55  ;;  %v920_v55 = vor.u32 1.1754944e-38, %v919_v57 }
 0x1bc   :  { %v872_v40 = vmul.f32 %v2495_v19, %v871_v24 }
 0x1bd   :  { %v891_v39 = vmul.f32 %v2497_v42, %v890_v45 }
 0x1be   :  { %v2499_v11 = vpop.eup %2498  ;;  %v873_v36 = vadd.f32 %v2495_v19, %v872_v40 }
 0x1bf   :  { %v892_v17 = vadd.f32 %v2497_v42, %v891_v39  ;;  %v909_v16 = vmul.f32 %v2499_v11, %v907_v56  ;;  %v2501_v0 = vpop.eup %2500  ;;  %vm914_vm4 = vweird.f32 %v2499_v11 }
 0x1c0   :  { %v877_v18 = vsel %vm876_vm0, %v2495_v19, %v873_v36  ;;  %v917_v19 = vand.u32 2147483647, %v907_v56  ;;  %vm915_vm6 = vmor %vm913_vm5, %vm914_vm4 }
 0x1c1   :  { %v882_v58 = vsel %vm879_vm2, %v881_v54, %v877_v18  ;;  %v896_v63 = vsel %vm895_vm1, %v2497_v42, %v892_v17  ;;  %v910_v27 = vsub.f32 1.0, %v909_v16  ;;  %v3386_v17 = vld [vmem:[#allocation20_spill] sm:$0xff] }
 0x1c2   :  { %v901_v38 = vsel %vm898_vm3, %v900_v31, %v896_v63  ;;  %v924_v12 = vmul.f32 %v2501_v0, %v882_v58  ;;  %vm918_vm7 = vcmp.eq.f32.partialorder %v917_v19, 8.507059e+37  ;;  %v3387_v19 = vld [vmem:[#allocation19_spill] sm:$0xff] }
 0x1c3   :  { %v923_v5 = vmul.f32 %v901_v38, %v3093_v6  ;;  %v911_v25 = vmul.f32 %v2499_v11, %v910_v27 }
 0x1c5   :  { %v3136_v30 = vadd.f32 %v924_v12, %v923_v5  ;;  %v912_v28 = vadd.f32 %v2499_v11, %v911_v25 }
 0x1c7   :  { %2502 = vtanh.f32 %v3136_v30  ;;  %v916_v23 = vsel %vm915_vm6, %v2499_v11, %v912_v28 }
 0x1c8   :  { %v921_v24 = vsel %vm918_vm7, %v920_v55, %v916_v23 }
 0x1cd   :  { %v2503_v42 = vpop.eup %2502 }
 0x1ce   :  { %v927_v45 = vmul.f32 %v2503_v42, %v921_v24 }
 0x1d0   :  { %v928_v50 = vpack.c.bf16 %v927_v45, %v927_v45 }
 0x1d2   :  { %944 = vmatmul.bf16.vlgmr.msrb.gmra.mxu0 %v928_v50  ;;  %957 = vmatmul.bf16.vlgmr.msrb.gmra.mxu1 %v928_v50 }
 0x1d3   :  { %970 = vmatmul.bf16.vlgmr.msrb.gmra.mxu2 %v928_v50  ;;  %983 = vmatmul.bf16.vlgmr.msrb.gmra.mxu3 %v928_v50 }
 0x1d4   :  { %1190 = vmatpush.bf16.msrb.mxu0 %v2834_v37  ;;  %1203 = vmatpush.bf16.msrb.mxu1 %v2836_v41 }
 0x1d5   :  { %1216 = vmatpush.bf16.msrb.mxu2 %v2838_v47  ;;  %1229 = vmatpush.bf16.msrb.mxu3 %v2841_v48 }
 0x1d8   :  { %1191 = vmatpush.bf16.msrb.mxu0 %v2843_v49  ;;  %1204 = vmatpush.bf16.msrb.mxu1 %v2846_v53 }
 0x1d9   :  { %1217 = vmatpush.bf16.msrb.mxu2 %v2849_v59  ;;  %1230 = vmatpush.bf16.msrb.mxu3 %v2853_v60 }
 0x1dc   :  { %1192 = vmatpush.bf16.msrb.mxu0 %v2855_v61  ;;  %1205 = vmatpush.bf16.msrb.mxu1 %v2858_v1 }
 0x1dd   :  { %1218 = vmatpush.bf16.msrb.mxu2 %v2861_v7  ;;  %1231 = vmatpush.bf16.msrb.mxu3 %v2865_v8 }
 0x1e0   :  { %1193 = vmatpush.bf16.msrb.mxu0 %v2867_v9  ;;  %1206 = vmatpush.bf16.msrb.mxu1 %v2870_v13 }
 0x1e1   :  { %1219 = vmatpush.bf16.msrb.mxu2 %v2873_v20  ;;  %1232 = vmatpush.bf16.msrb.mxu3 %v2877_v21 }
 0x1e4   :  { %1194 = vmatpush.bf16.msrb.mxu0 %v2879_v22  ;;  %1207 = vmatpush.bf16.msrb.mxu1 %v2882_v26 }
 0x1e5   :  { %1220 = vmatpush.bf16.msrb.mxu2 %v2885_v32  ;;  %1233 = vmatpush.bf16.msrb.mxu3 %v2889_v33 }
 0x1e8   :  { %1195 = vmatpush.bf16.msrb.mxu0 %v2891_v34  ;;  %1208 = vmatpush.bf16.msrb.mxu1 %v2894_v35 }
 0x1e9   :  { %1221 = vmatpush.bf16.msrb.mxu2 %v2906_v52  ;;  %1234 = vmatpush.bf16.msrb.mxu3 %v2899_v43 }
 0x1ec   :  { %1196 = vmatpush.bf16.msrb.mxu0 %v2901_v44  ;;  %1209 = vmatpush.bf16.msrb.mxu1 %v2904_v51 }
 0x1ed   :  { %1222 = vmatpush.bf16.msrb.mxu2 %v2915_v4  ;;  %1235 = vmatpush.bf16.msrb.mxu3 %v2911_v2 }
 0x1f0   :  { %1197 = vmatpush.bf16.msrb.mxu0 %v2913_v3  ;;  %1210 = vmatpush.bf16.msrb.mxu1 %v2918_v10 }
 0x1f1   :  { %1223 = vmatpush.bf16.msrb.mxu2 %v2921_v14  ;;  %1236 = vmatpush.bf16.msrb.mxu3 %v2925_v15 }
 0x24f   :  { %v945_v6 = vpop.f32.mrf.mxu0  ;;  %v958_v56 = vpop.f32.mrf.mxu1 }
 0x250   :  { %v988_v40 = vadd.f32 %v945_v6, %v3384_v62  ;;  %v989_v39 = vadd.f32 %v958_v56, %v3385_v46 }
 0x252   :  { %v2248_v29 = vmul.f32 -1.442695, %v988_v40  ;;  %v2249_v11 = vmul.f32 -1.442695, %v989_v39 }
 0x254   :  { %2504 = vpow2.f32 %v2248_v29 }
 0x255   :  { %2506 = vpow2.f32 %v2249_v11 }
 0x256   :  { %v971_v36 = vpop.f32.mrf.mxu2  ;;  %v984_v54 = vpop.f32.mrf.mxu3 }
 0x257   :  { %v991_v16 = vadd.f32 %v984_v54, %v3386_v17  ;;  %v947_v31 = vpop.f32.mrf.mxu0  ;;  %v960_v18 = vpop.f32.mrf.mxu1  ;;  %v990_v23 = vadd.f32 %v971_v36, %v3387_v19 }
 0x259   :  { %v2250_v0 = vmul.f32 -1.442695, %v991_v16 }
 0x25a   :  { %v2505_v58 = vpop.eup %2504 }
 0x25b   :  { %v2507_v63 = vpop.eup %2506  ;;  %v995_v27 = vadd.f32 1.0, %v2505_v58  ;;  %2508 = vpow2.f32 %v2250_v0 }
 0x25c   :  { %v1014_v38 = vadd.f32 1.0, %v2507_v63 }
 0x25d   :  { %2510 = vrcp.f32 %v995_v27  ;;  %v1007_v6 = vand.u32 2147483648, %v995_v27  ;;  %v1005_v40 = vand.u32 2147483647, %v995_v27  ;;  %vm1001_vm10 = vweird.f32 %v995_v27 }
 0x25e   :  { %2512 = vrcp.f32 %v1014_v38  ;;  %v973_v12 = vpop.f32.mrf.mxu2  ;;  %v986_v5 = vpop.f32.mrf.mxu3  ;;  %v1026_v56 = vand.u32 2147483648, %v1014_v38  ;;  %v1024_v39 = vand.u32 2147483647, %v1014_v38  ;;  %vm1020_vm11 = vweird.f32 %v1014_v38 }
 0x25f   :  { %v1008_v36 = vor.u32 1.1754944e-38, %v1007_v6  ;;  %vm1006_vm14 = vcmp.eq.f32.partialorder %v1005_v40, 8.507059e+37  ;;  %v3389_v40 = vld [vmem:[#allocation22_spill] sm:$0xff] }
 0x260   :  { %v1027_v16 = vor.u32 1.1754944e-38, %v1026_v56  ;;  %vm1025_vm15 = vcmp.eq.f32.partialorder %v1024_v39, 8.507059e+37  ;;  %v3388_v56 = vld [vmem:[#allocation21_spill] sm:$0xff] }
 0x261   :  { %v2509_v25 = vpop.eup %2508 }
 0x262   :  { %v1034_v28 = vadd.f32 1.0, %v2509_v25 }
 0x263   :  { %v2511_v57 = vpop.eup %2510 }
 0x264   :  { %v2513_v55 = vpop.eup %2512  ;;  %v997_v42 = vmul.f32 %v2511_v57, %v995_v27  ;;  %2514 = vrcp.f32 %v1034_v28  ;;  %vm1002_vm8 = vweird.f32 %v2511_v57  ;;  %vm1040_vm1 = vweird.f32 %v1034_v28 }
 0x265   :  { %v1016_v24 = vmul.f32 %v2513_v55, %v1014_v38  ;;  %2516 = vtanh.f32 %v990_v23  ;;  %vm1021_vm9 = vweird.f32 %v2513_v55  ;;  %vm1003_vm12 = vmor %vm1001_vm10, %vm1002_vm8  ;;  %v1046_v23 = vand.u32 2147483648, %v1034_v28 }
 0x266   :  { %v998_v45 = vsub.f32 1.0, %v997_v42  ;;  %vm1022_vm13 = vmor %vm1020_vm11, %vm1021_vm9 }
 0x267   :  { %v1017_v50 = vsub.f32 1.0, %v1016_v24  ;;  %v1047_v24 = vor.u32 1.1754944e-38, %v1046_v23 }
 0x268   :  { %v999_v62 = vmul.f32 %v2511_v57, %v998_v45 }
 0x269   :  { %v1018_v46 = vmul.f32 %v2513_v55, %v1017_v50 }
 0x26a   :  { %v2515_v29 = vpop.eup %2514  ;;  %v1000_v11 = vadd.f32 %v2511_v57, %v999_v62 }
 0x26b   :  { %v1019_v54 = vadd.f32 %v2513_v55, %v1018_v46  ;;  %v1036_v17 = vmul.f32 %v2515_v29, %v1034_v28  ;;  %v2517_v18 = vpop.eup %2516  ;;  %vm1041_vm0 = vweird.f32 %v2515_v29 }
 0x26c   :  { %v1004_v31 = vsel %vm1003_vm12, %v2511_v57, %v1000_v11  ;;  %v1044_v57 = vand.u32 2147483647, %v1034_v28  ;;  %vm1042_vm2 = vmor %vm1040_vm1, %vm1041_vm0 }
 0x26d   :  { %v1009_v0 = vsel %vm1006_vm14, %v1008_v36, %v1004_v31  ;;  %v1023_v58 = vsel %vm1022_vm13, %v2513_v55, %v1019_v54  ;;  %v1037_v63 = vsub.f32 1.0, %v1036_v17  ;;  %v3390_v54 = vld [vmem:[#allocation24_spill] sm:$0xff] }
 0x26e   :  { %v1028_v12 = vsel %vm1025_vm15, %v1027_v16, %v1023_v58  ;;  %v1051_v5 = vmul.f32 %v2517_v18, %v1009_v0  ;;  %vm1045_vm3 = vcmp.eq.f32.partialorder %v1044_v57, 8.507059e+37  ;;  %v3391_v57 = vld [vmem:[#allocation23_spill] sm:$0xff] }
 0x26f   :  { %v1050_v25 = vmul.f32 %v1028_v12, %v3136_v30  ;;  %v1038_v19 = vmul.f32 %v2515_v29, %v1037_v63 }
 0x271   :  { %v3176_v27 = vadd.f32 %v1051_v5, %v1050_v25  ;;  %v1039_v38 = vadd.f32 %v2515_v29, %v1038_v19 }
 0x273   :  { %2518 = vtanh.f32 %v3176_v27  ;;  %v1043_v42 = vsel %vm1042_vm2, %v2515_v29, %v1039_v38 }
 0x274   :  { %v1048_v45 = vsel %vm1045_vm3, %v1047_v24, %v1043_v42 }
 0x279   :  { %v2519_v55 = vpop.eup %2518 }
 0x27a   :  { %v1054_v50 = vmul.f32 %v2519_v55, %v1048_v45 }
 0x27c   :  { %v1055_v6 = vpack.c.bf16 %v1054_v50, %v1054_v50 }
 0x27e   :  { %1071 = vmatmul.bf16.vlgmr.msra.gmra.mxu0 %v1055_v6  ;;  %1084 = vmatmul.bf16.vlgmr.msra.gmra.mxu1 %v1055_v6 }
 0x27f   :  { %1097 = vmatmul.bf16.vlgmr.msra.gmra.mxu2 %v1055_v6  ;;  %1110 = vmatmul.bf16.vlgmr.msra.gmra.mxu3 %v1055_v6 }
 0x280   :  { %1317 = vmatpush.bf16.msra.mxu0 %v2834_v37  ;;  %1330 = vmatpush.bf16.msra.mxu1 %v2836_v41 }
 0x281   :  { %1343 = vmatpush.bf16.msra.mxu2 %v2838_v47  ;;  %1356 = vmatpush.bf16.msra.mxu3 %v2841_v48 }
 0x284   :  { %1318 = vmatpush.bf16.msra.mxu0 %v2843_v49  ;;  %1331 = vmatpush.bf16.msra.mxu1 %v2846_v53 }
 0x285   :  { %1344 = vmatpush.bf16.msra.mxu2 %v2849_v59  ;;  %1357 = vmatpush.bf16.msra.mxu3 %v2853_v60 }
 0x288   :  { %1319 = vmatpush.bf16.msra.mxu0 %v2855_v61  ;;  %1332 = vmatpush.bf16.msra.mxu1 %v2858_v1 }
 0x289   :  { %1345 = vmatpush.bf16.msra.mxu2 %v2861_v7  ;;  %1358 = vmatpush.bf16.msra.mxu3 %v2865_v8 }
 0x28c   :  { %1320 = vmatpush.bf16.msra.mxu0 %v2867_v9  ;;  %1333 = vmatpush.bf16.msra.mxu1 %v2870_v13 }
 0x28d   :  { %1346 = vmatpush.bf16.msra.mxu2 %v2873_v20  ;;  %1359 = vmatpush.bf16.msra.mxu3 %v2877_v21 }
 0x290   :  { %1321 = vmatpush.bf16.msra.mxu0 %v2879_v22  ;;  %1334 = vmatpush.bf16.msra.mxu1 %v2882_v26 }
 0x291   :  { %1347 = vmatpush.bf16.msra.mxu2 %v2885_v32  ;;  %1360 = vmatpush.bf16.msra.mxu3 %v2889_v33 }
 0x294   :  { %1322 = vmatpush.bf16.msra.mxu0 %v2891_v34  ;;  %1335 = vmatpush.bf16.msra.mxu1 %v2894_v35 }
 0x295   :  { %1348 = vmatpush.bf16.msra.mxu2 %v2906_v52  ;;  %1361 = vmatpush.bf16.msra.mxu3 %v2899_v43 }
 0x298   :  { %1323 = vmatpush.bf16.msra.mxu0 %v2901_v44  ;;  %1336 = vmatpush.bf16.msra.mxu1 %v2904_v51 }
 0x299   :  { %1349 = vmatpush.bf16.msra.mxu2 %v2915_v4  ;;  %1362 = vmatpush.bf16.msra.mxu3 %v2911_v2 }
 0x29c   :  { %1324 = vmatpush.bf16.msra.mxu0 %v2913_v3  ;;  %1337 = vmatpush.bf16.msra.mxu1 %v2918_v10 }
 0x29d   :  { %1350 = vmatpush.bf16.msra.mxu2 %v2921_v14  ;;  %1363 = vmatpush.bf16.msra.mxu3 %v2925_v15 }
 0x2fb   :  { %v1072_v30 = vpop.f32.mrf.mxu0  ;;  %v1085_v28 = vpop.f32.mrf.mxu1 }
 0x2fc   :  { %v1115_v62 = vadd.f32 %v1072_v30, %v3388_v56  ;;  %v1116_v46 = vadd.f32 %v1085_v28, %v3389_v40 }
 0x2fe   :  { %v2251_v39 = vmul.f32 -1.442695, %v1115_v62  ;;  %v2252_v29 = vmul.f32 -1.442695, %v1116_v46 }
 0x300   :  { %2520 = vpow2.f32 %v2251_v39 }
 0x301   :  { %2522 = vpow2.f32 %v2252_v29 }
 0x302   :  { %v1098_v11 = vpop.f32.mrf.mxu2  ;;  %v1111_v36 = vpop.f32.mrf.mxu3 }
 0x303   :  { %v1118_v17 = vadd.f32 %v1111_v36, %v3390_v54  ;;  %v1074_v16 = vpop.f32.mrf.mxu0  ;;  %v1087_v31 = vpop.f32.mrf.mxu1  ;;  %v1117_v42 = vadd.f32 %v1098_v11, %v3391_v57 }
 0x305   :  { %v2253_v18 = vmul.f32 -1.442695, %v1118_v17 }
 0x306   :  { %v2521_v0 = vpop.eup %2520 }
 0x307   :  { %v2523_v58 = vpop.eup %2522  ;;  %v1122_v63 = vadd.f32 1.0, %v2521_v0  ;;  %2524 = vpow2.f32 %v2253_v18 }
 0x308   :  { %v1141_v12 = vadd.f32 1.0, %v2523_v58 }
 0x309   :  { %2526 = vrcp.f32 %v1122_v63  ;;  %v1134_v30 = vand.u32 2147483648, %v1122_v63  ;;  %v1132_v62 = vand.u32 2147483647, %v1122_v63  ;;  %vm1128_vm6 = vweird.f32 %v1122_v63 }
 0x30a   :  { %2528 = vrcp.f32 %v1141_v12  ;;  %v1100_v5 = vpop.f32.mrf.mxu2  ;;  %v1113_v25 = vpop.f32.mrf.mxu3  ;;  %v1153_v28 = vand.u32 2147483648, %v1141_v12  ;;  %v1151_v46 = vand.u32 2147483647, %v1141_v12  ;;  %vm1147_vm7 = vweird.f32 %v1141_v12 }
 0x30b   :  { %v1135_v11 = vor.u32 1.1754944e-38, %v1134_v30  ;;  %vm1133_vm10 = vcmp.eq.f32.partialorder %v1132_v62, 8.507059e+37  ;;  %v3393_v62 = vld [vmem:[#allocation26_spill] sm:$0xff] }
 0x30c   :  { %v1154_v17 = vor.u32 1.1754944e-38, %v1153_v28  ;;  %vm1152_vm11 = vcmp.eq.f32.partialorder %v1151_v46, 8.507059e+37  ;;  %v3392_v28 = vld [vmem:[#allocation25_spill] sm:$0xff] }
 0x30d   :  { %v2525_v19 = vpop.eup %2524 }
 0x30e   :  { %v1161_v38 = vadd.f32 1.0, %v2525_v19 }
 0x30f   :  { %v2527_v23 = vpop.eup %2526 }
 0x310   :  { %v2529_v24 = vpop.eup %2528  ;;  %v1124_v55 = vmul.f32 %v2527_v23, %v1122_v63  ;;  %2530 = vrcp.f32 %v1161_v38  ;;  %vm1129_vm4 = vweird.f32 %v2527_v23  ;;  %vm1167_vm13 = vweird.f32 %v1161_v38 }
 0x311   :  { %v1143_v45 = vmul.f32 %v2529_v24, %v1141_v12  ;;  %2532 = vtanh.f32 %v1117_v42  ;;  %vm1148_vm5 = vweird.f32 %v2529_v24  ;;  %vm1130_vm8 = vmor %vm1128_vm6, %vm1129_vm4  ;;  %v1173_v42 = vand.u32 2147483648, %v1161_v38 }
 0x312   :  { %v1125_v50 = vsub.f32 1.0, %v1124_v55  ;;  %vm1149_vm9 = vmor %vm1147_vm7, %vm1148_vm5 }
 0x313   :  { %v1144_v6 = vsub.f32 1.0, %v1143_v45  ;;  %v1174_v45 = vor.u32 1.1754944e-38, %v1173_v42 }
 0x314   :  { %v1126_v56 = vmul.f32 %v2527_v23, %v1125_v50 }
 0x315   :  { %v1145_v40 = vmul.f32 %v2529_v24, %v1144_v6 }
 0x316   :  { %v2531_v39 = vpop.eup %2530  ;;  %v1127_v29 = vadd.f32 %v2527_v23, %v1126_v56 }
 0x317   :  { %v1146_v36 = vadd.f32 %v2529_v24, %v1145_v40  ;;  %v1163_v54 = vmul.f32 %v2531_v39, %v1161_v38  ;;  %v2533_v31 = vpop.eup %2532  ;;  %vm1168_vm12 = vweird.f32 %v2531_v39 }
 0x318   :  { %v1131_v16 = vsel %vm1130_vm8, %v2527_v23, %v1127_v29  ;;  %v1171_v23 = vand.u32 2147483647, %v1161_v38  ;;  %vm1169_vm14 = vmor %vm1167_vm13, %vm1168_vm12 }
 0x319   :  { %v1136_v18 = vsel %vm1133_vm10, %v1135_v11, %v1131_v16  ;;  %v1150_v0 = vsel %vm1149_vm9, %v2529_v24, %v1146_v36  ;;  %v1164_v58 = vsub.f32 1.0, %v1163_v54  ;;  %v3394_v36 = vld [vmem:[#allocation28_spill] sm:$0xff] }
 0x31a   :  { %v1155_v5 = vsel %vm1152_vm11, %v1154_v17, %v1150_v0  ;;  %v1178_v25 = vmul.f32 %v2533_v31, %v1136_v18  ;;  %vm1172_vm15 = vcmp.eq.f32.partialorder %v1171_v23, 8.507059e+37  ;;  %v3395_v23 = vld [vmem:[#allocation27_spill] sm:$0xff] }
 0x31b   :  { %v1177_v19 = vmul.f32 %v1155_v5, %v3176_v27  ;;  %v1165_v57 = vmul.f32 %v2531_v39, %v1164_v58 }
 0x31d   :  { %v3216_v63 = vadd.f32 %v1178_v25, %v1177_v19  ;;  %v1166_v12 = vadd.f32 %v2531_v39, %v1165_v57 }
 0x31f   :  { %2534 = vtanh.f32 %v3216_v63  ;;  %v1170_v55 = vsel %vm1169_vm14, %v2531_v39, %v1166_v12 }
 0x320   :  { %v1175_v50 = vsel %vm1172_vm15, %v1174_v45, %v1170_v55 }
 0x325   :  { %v2535_v24 = vpop.eup %2534 }
 0x326   :  { %v1181_v6 = vmul.f32 %v2535_v24, %v1175_v50 }
 0x328   :  { %v1182_v30 = vpack.c.bf16 %v1181_v6, %v1181_v6 }
 0x32a   :  { %1198 = vmatmul.bf16.vlgmr.msrb.gmra.mxu0 %v1182_v30  ;;  %1211 = vmatmul.bf16.vlgmr.msrb.gmra.mxu1 %v1182_v30 }
 0x32b   :  { %1224 = vmatmul.bf16.vlgmr.msrb.gmra.mxu2 %v1182_v30  ;;  %1237 = vmatmul.bf16.vlgmr.msrb.gmra.mxu3 %v1182_v30 }
 0x32c   :  { %1444 = vmatpush.bf16.msrb.mxu0 %v2834_v37  ;;  %1457 = vmatpush.bf16.msrb.mxu1 %v2836_v41 }
 0x32d   :  { %1470 = vmatpush.bf16.msrb.mxu2 %v2838_v47  ;;  %1483 = vmatpush.bf16.msrb.mxu3 %v2841_v48 }
 0x330   :  { %1445 = vmatpush.bf16.msrb.mxu0 %v2843_v49  ;;  %1458 = vmatpush.bf16.msrb.mxu1 %v2846_v53 }
 0x331   :  { %1471 = vmatpush.bf16.msrb.mxu2 %v2849_v59  ;;  %1484 = vmatpush.bf16.msrb.mxu3 %v2853_v60 }
 0x334   :  { %1446 = vmatpush.bf16.msrb.mxu0 %v2855_v61  ;;  %1459 = vmatpush.bf16.msrb.mxu1 %v2858_v1 }
 0x335   :  { %1472 = vmatpush.bf16.msrb.mxu2 %v2861_v7  ;;  %1485 = vmatpush.bf16.msrb.mxu3 %v2865_v8 }
 0x338   :  { %1447 = vmatpush.bf16.msrb.mxu0 %v2867_v9  ;;  %1460 = vmatpush.bf16.msrb.mxu1 %v2870_v13 }
 0x339   :  { %1473 = vmatpush.bf16.msrb.mxu2 %v2873_v20  ;;  %1486 = vmatpush.bf16.msrb.mxu3 %v2877_v21 }
 0x33c   :  { %1448 = vmatpush.bf16.msrb.mxu0 %v2879_v22  ;;  %1461 = vmatpush.bf16.msrb.mxu1 %v2882_v26 }
 0x33d   :  { %1474 = vmatpush.bf16.msrb.mxu2 %v2885_v32  ;;  %1487 = vmatpush.bf16.msrb.mxu3 %v2889_v33 }
 0x340   :  { %1449 = vmatpush.bf16.msrb.mxu0 %v2891_v34  ;;  %1462 = vmatpush.bf16.msrb.mxu1 %v2894_v35 }
 0x341   :  { %1475 = vmatpush.bf16.msrb.mxu2 %v2906_v52  ;;  %1488 = vmatpush.bf16.msrb.mxu3 %v2899_v43 }
 0x344   :  { %1450 = vmatpush.bf16.msrb.mxu0 %v2901_v44  ;;  %1463 = vmatpush.bf16.msrb.mxu1 %v2904_v51 }
 0x345   :  { %1476 = vmatpush.bf16.msrb.mxu2 %v2915_v4  ;;  %1489 = vmatpush.bf16.msrb.mxu3 %v2911_v2 }
 0x348   :  { %1451 = vmatpush.bf16.msrb.mxu0 %v2913_v3  ;;  %1464 = vmatpush.bf16.msrb.mxu1 %v2918_v10 }
 0x349   :  { %1477 = vmatpush.bf16.msrb.mxu2 %v2921_v14  ;;  %1490 = vmatpush.bf16.msrb.mxu3 %v2925_v15 }
 0x3a7   :  { %v1199_v27 = vpop.f32.mrf.mxu0  ;;  %v1212_v38 = vpop.f32.mrf.mxu1 }
 0x3a8   :  { %v1242_v56 = vadd.f32 %v1199_v27, %v3392_v28  ;;  %v1243_v40 = vadd.f32 %v1212_v38, %v3393_v62 }
 0x3aa   :  { %v2254_v46 = vmul.f32 -1.442695, %v1242_v56  ;;  %v2255_v39 = vmul.f32 -1.442695, %v1243_v40 }
 0x3ac   :  { %2536 = vpow2.f32 %v2254_v46 }
 0x3ad   :  { %2538 = vpow2.f32 %v2255_v39 }
 0x3ae   :  { %v1225_v29 = vpop.f32.mrf.mxu2  ;;  %v1238_v11 = vpop.f32.mrf.mxu3 }
 0x3af   :  { %v1245_v54 = vadd.f32 %v1238_v11, %v3394_v36  ;;  %v1201_v17 = vpop.f32.mrf.mxu0  ;;  %v1214_v16 = vpop.f32.mrf.mxu1  ;;  %v1244_v55 = vadd.f32 %v1225_v29, %v3395_v23 }
 0x3b1   :  { %v2256_v31 = vmul.f32 -1.442695, %v1245_v54 }
 0x3b2   :  { %v2537_v18 = vpop.eup %2536 }
 0x3b3   :  { %v2539_v0 = vpop.eup %2538  ;;  %v1249_v58 = vadd.f32 1.0, %v2537_v18  ;;  %2540 = vpow2.f32 %v2256_v31 }
 0x3b4   :  { %v1268_v5 = vadd.f32 1.0, %v2539_v0 }
 0x3b5   :  { %2542 = vrcp.f32 %v1249_v58  ;;  %v1261_v27 = vand.u32 2147483648, %v1249_v58  ;;  %v1259_v56 = vand.u32 2147483647, %v1249_v58  ;;  %vm1255_vm2 = vweird.f32 %v1249_v58 }
 0x3b6   :  { %2544 = vrcp.f32 %v1268_v5  ;;  %v1227_v25 = vpop.f32.mrf.mxu2  ;;  %v1240_v19 = vpop.f32.mrf.mxu3  ;;  %v1280_v38 = vand.u32 2147483648, %v1268_v5  ;;  %v1278_v40 = vand.u32 2147483647, %v1268_v5  ;;  %vm1274_vm3 = vweird.f32 %v1268_v5 }
 0x3b7   :  { %v1262_v29 = vor.u32 1.1754944e-38, %v1261_v27  ;;  %vm1260_vm6 = vcmp.eq.f32.partialorder %v1259_v56, 8.507059e+37 }
 0x3b8   :  { %v1281_v54 = vor.u32 1.1754944e-38, %v1280_v38  ;;  %vm1279_vm7 = vcmp.eq.f32.partialorder %v1278_v40, 8.507059e+37 }
 0x3b9   :  { %v2541_v57 = vpop.eup %2540 }
 0x3ba   :  { %v1288_v12 = vadd.f32 1.0, %v2541_v57 }
 0x3bb   :  { %v2543_v42 = vpop.eup %2542 }
 0x3bc   :  { %v2545_v45 = vpop.eup %2544  ;;  %v1251_v24 = vmul.f32 %v2543_v42, %v1249_v58  ;;  %2546 = vrcp.f32 %v1288_v12  ;;  %vm1256_vm0 = vweird.f32 %v2543_v42  ;;  %vm1294_vm9 = vweird.f32 %v1288_v12 }
 0x3bd   :  { %v1270_v50 = vmul.f32 %v2545_v45, %v1268_v5  ;;  %2548 = vtanh.f32 %v1244_v55  ;;  %vm1275_vm1 = vweird.f32 %v2545_v45  ;;  %vm1257_vm4 = vmor %vm1255_vm2, %vm1256_vm0  ;;  %v1300_v55 = vand.u32 2147483648, %v1288_v12 }
 0x3be   :  { %v1252_v6 = vsub.f32 1.0, %v1251_v24  ;;  %vm1276_vm5 = vmor %vm1274_vm3, %vm1275_vm1 }
 0x3bf   :  { %v1271_v30 = vsub.f32 1.0, %v1270_v50  ;;  %v1301_v50 = vor.u32 1.1754944e-38, %v1300_v55 }
 0x3c0   :  { %v1253_v28 = vmul.f32 %v2543_v42, %v1252_v6 }
 0x3c1   :  { %v1272_v62 = vmul.f32 %v2545_v45, %v1271_v30 }
 0x3c2   :  { %v2547_v46 = vpop.eup %2546  ;;  %v1254_v39 = vadd.f32 %v2543_v42, %v1253_v28 }
 0x3c3   :  { %v1273_v11 = vadd.f32 %v2545_v45, %v1272_v62  ;;  %v1290_v36 = vmul.f32 %v2547_v46, %v1288_v12  ;;  %v2549_v16 = vpop.eup %2548  ;;  %vm1295_vm8 = vweird.f32 %v2547_v46 }
 0x3c4   :  { %v1258_v17 = vsel %vm1257_vm4, %v2543_v42, %v1254_v39  ;;  %v1298_v42 = vand.u32 2147483647, %v1288_v12  ;;  %vm1296_vm10 = vmor %vm1294_vm9, %vm1295_vm8 }
 0x3c5   :  { %v1263_v31 = vsel %vm1260_vm6, %v1262_v29, %v1258_v17  ;;  %v1277_v18 = vsel %vm1276_vm5, %v2545_v45, %v1273_v11  ;;  %v1291_v0 = vsub.f32 1.0, %v1290_v36 }
 0x3c6   :  { %v1282_v25 = vsel %vm1279_vm7, %v1281_v54, %v1277_v18  ;;  %v1305_v19 = vmul.f32 %v2549_v16, %v1263_v31  ;;  %vm1299_vm11 = vcmp.eq.f32.partialorder %v1298_v42, 8.507059e+37 }
 0x3c7   :  { %v1304_v57 = vmul.f32 %v1282_v25, %v3216_v63  ;;  %v1292_v23 = vmul.f32 %v2547_v46, %v1291_v0 }
 0x3c9   :  { %v3256_v58 = vadd.f32 %v1305_v19, %v1304_v57  ;;  %v1293_v5 = vadd.f32 %v2547_v46, %v1292_v23 }
 0x3cb   :  { %2550 = vtanh.f32 %v3256_v58  ;;  %v1297_v24 = vsel %vm1296_vm10, %v2547_v46, %v1293_v5 }
 0x3cc   :  { %v1302_v6 = vsel %vm1299_vm11, %v1301_v50, %v1297_v24 }
 0x3d1   :  { %v2551_v45 = vpop.eup %2550 }
 0x3d2   :  { %v1308_v30 = vmul.f32 %v2551_v45, %v1302_v6 }
 0x3d4   :  { %v1309_v27 = vpack.c.bf16 %v1308_v30, %v1308_v30 }
 0x3d6   :  { %1325 = vmatmul.bf16.vlgmr.msra.gmra.mxu0 %v1309_v27  ;;  %1338 = vmatmul.bf16.vlgmr.msra.gmra.mxu1 %v1309_v27 }
 0x3d7   :  { %1351 = vmatmul.bf16.vlgmr.msra.gmra.mxu2 %v1309_v27  ;;  %1364 = vmatmul.bf16.vlgmr.msra.gmra.mxu3 %v1309_v27  ;;  %v2454_v27 = vld [vmem:[#allocation11 + $0xec] sm:$0xf0] }
 0x3d8   :  { %1571 = vmatpush.bf16.msra.mxu0 %v2834_v37  ;;  %1597 = vmatpush.bf16.msra.mxu2 %v2838_v47  ;;  %v3396_v47 = vld [vmem:[#allocation29_spill] sm:$0xff] }
 0x3d9   :  { %1584 = vmatpush.bf16.msra.mxu1 %v2836_v41  ;;  %1610 = vmatpush.bf16.msra.mxu3 %v2841_v48 }
 0x3dc   :  { %1572 = vmatpush.bf16.msra.mxu0 %v2843_v49  ;;  %1598 = vmatpush.bf16.msra.mxu2 %v2849_v59  ;;  %v3397_v49 = vld [vmem:[#allocation30_spill] sm:$0xff] }
 0x3dd   :  { %1585 = vmatpush.bf16.msra.mxu1 %v2846_v53  ;;  %1611 = vmatpush.bf16.msra.mxu3 %v2853_v60 }
 0x3e0   :  { %1573 = vmatpush.bf16.msra.mxu0 %v2855_v61  ;;  %1599 = vmatpush.bf16.msra.mxu2 %v2861_v7  ;;  %v3398_v7 = vld [vmem:[#allocation32_spill] sm:$0xff] }
 0x3e1   :  { %1586 = vmatpush.bf16.msra.mxu1 %v2858_v1  ;;  %1612 = vmatpush.bf16.msra.mxu3 %v2865_v8 }
 0x3e4   :  { %1574 = vmatpush.bf16.msra.mxu0 %v2867_v9  ;;  %1600 = vmatpush.bf16.msra.mxu2 %v2873_v20 }
 0x3e5   :  { %1587 = vmatpush.bf16.msra.mxu1 %v2870_v13  ;;  %1613 = vmatpush.bf16.msra.mxu3 %v2877_v21 }
 0x3e8   :  { %1575 = vmatpush.bf16.msra.mxu0 %v2879_v22  ;;  %1601 = vmatpush.bf16.msra.mxu2 %v2885_v32 }
 0x3e9   :  { %1588 = vmatpush.bf16.msra.mxu1 %v2882_v26  ;;  %1614 = vmatpush.bf16.msra.mxu3 %v2889_v33 }
 0x3ec   :  { %1576 = vmatpush.bf16.msra.mxu0 %v2891_v34  ;;  %1602 = vmatpush.bf16.msra.mxu2 %v2906_v52 }
 0x3ed   :  { %1589 = vmatpush.bf16.msra.mxu1 %v2894_v35  ;;  %1615 = vmatpush.bf16.msra.mxu3 %v2899_v43 }
 0x3f0   :  { %1577 = vmatpush.bf16.msra.mxu0 %v2901_v44  ;;  %1603 = vmatpush.bf16.msra.mxu2 %v2915_v4 }
 0x3f1   :  { %1590 = vmatpush.bf16.msra.mxu1 %v2904_v51  ;;  %1616 = vmatpush.bf16.msra.mxu3 %v2911_v2  ;;  %v3399_v51 = vld [vmem:[#allocation31_spill] sm:$0xff] }
 0x3f4   :  { %1578 = vmatpush.bf16.msra.mxu0 %v2913_v3  ;;  %1604 = vmatpush.bf16.msra.mxu2 %v2921_v14 }
 0x3f5   :  { %1591 = vmatpush.bf16.msra.mxu1 %v2918_v10  ;;  %1617 = vmatpush.bf16.msra.mxu3 %v2925_v15 }
 0x453   :  { %v1326_v37 = vpop.f32.mrf.mxu0  ;;  %v1339_v41 = vpop.f32.mrf.mxu1 }
 0x454   :  { %v1369_v48 = vadd.f32 %v1326_v37, %v3396_v47  ;;  %v1370_v53 = vadd.f32 %v1339_v41, %v3397_v49  ;;  %v2453_v37 = vld [vmem:[#allocation11 + $0xec] sm:$0xf]  ;;  %v2358_v47 = vld [vmem:[#allocation11 + $0xf8] sm:$0xf0] }
 0x456   :  { %v2257_v59 = vmul.f32 -1.442695, %v1369_v48  ;;  %v2258_v60 = vmul.f32 -1.442695, %v1370_v53  ;;  %v2361_v48 = vor.u32 %v2453_v37, %v2358_v47 }
 0x458   :  { %2552 = vpow2.f32 %v2257_v59  ;;  %v3400_v59 = vld [vmem:[#allocation33_spill] sm:$0xff] }
 0x459   :  { %2554 = vpow2.f32 %v2258_v60 }
 0x45a   :  { %v1352_v61 = vpop.f32.mrf.mxu2  ;;  %v1365_v1 = vpop.f32.mrf.mxu3 }
 0x45b   :  { %v1372_v8 = vadd.f32 %v1365_v1, %v3398_v7  ;;  %v1328_v9 = vpop.f32.mrf.mxu0  ;;  %v1341_v13 = vpop.f32.mrf.mxu1  ;;  %v1371_v52 = vadd.f32 %v1352_v61, %v3399_v51  ;;  %v3401_v61 = vld [vmem:[#allocation34_spill] sm:$0xff]  ;;  %v2340_v7 = vld [vmem:[#allocation11 + $0xc0] sm:$0xf] }
 0x45c   :  { %v2450_v9 = vld [vmem:[#allocation11 + $0xcc] sm:$0xf]  ;;  %v2445_v51 = vld [vmem:[#allocation11 + $0x8c] sm:$0xf0] }
 0x45d   :  { %v2259_v20 = vmul.f32 -1.442695, %v1372_v8  ;;  %v2451_v8 = vld [vmem:[#allocation11 + $0xcc] sm:$0xf0] }
 0x45e   :  { %v2553_v21 = vpop.eup %2552  ;;  %v2341_v13 = vor.u32 %v2451_v8, %v2340_v7  ;;  %v2286_v7 = vld [vmem:[#allocation11 + $0x38] sm:$0xf0] }
 0x45f   :  { %v2555_v22 = vpop.eup %2554  ;;  %v1376_v26 = vadd.f32 1.0, %v2553_v21  ;;  %2556 = vpow2.f32 %v2259_v20  ;;  %v2346_v20 = vld [vmem:[#allocation11 + $0xd8] sm:$0xf0] }
 0x460   :  { %v1395_v32 = vadd.f32 1.0, %v2555_v22 }
 0x461   :  { %2558 = vrcp.f32 %v1376_v26  ;;  %v1388_v15 = vand.u32 2147483648, %v1376_v26  ;;  %v1386_v38 = vand.u32 2147483647, %v1376_v26  ;;  %vm1382_vm14 = vweird.f32 %v1376_v26 }
 0x462   :  { %2560 = vrcp.f32 %v1395_v32  ;;  %v1354_v33 = vpop.f32.mrf.mxu2  ;;  %v1367_v34 = vpop.f32.mrf.mxu3  ;;  %v1407_v63 = vand.u32 2147483648, %v1395_v32  ;;  %v1405_v56 = vand.u32 2147483647, %v1395_v32  ;;  %vm1401_vm15 = vweird.f32 %v1395_v32 }
 0x463   :  { %v1389_v46 = vor.u32 1.1754944e-38, %v1388_v15  ;;  %vm1387_vm2 = vcmp.eq.f32.partialorder %v1386_v38, 8.507059e+37  ;;  %v2448_v33 = vld [vmem:[#allocation11 + $0xac] sm:$0xf0]  ;;  %v2447_v34 = vld [vmem:[#allocation11 + $0xac] sm:$0xf] }
 0x464   :  { %v1408_v11 = vor.u32 1.1754944e-38, %v1407_v63  ;;  %vm1406_vm3 = vcmp.eq.f32.partialorder %v1405_v56, 8.507059e+37  ;;  %v2455_v15 = vld [vmem:[#allocation11 + $0xf4] sm:$0xf0]  ;;  %v3402_v63 = vld [vmem:[#allocation36_spill] sm:$0xff] }
 0x465   :  { %v2557_v35 = vpop.eup %2556 }
 0x466   :  { %v1415_v43 = vadd.f32 1.0, %v2557_v35 }
 0x467   :  { %v2559_v44 = vpop.eup %2558 }
 0x468   :  { %v2561_v2 = vpop.eup %2560  ;;  %v1378_v3 = vmul.f32 %v2559_v44, %v1376_v26  ;;  %2562 = vrcp.f32 %v1415_v43  ;;  %vm1383_vm12 = vweird.f32 %v2559_v44  ;;  %v1427_v5 = vand.u32 2147483648, %v1415_v43 }
 0x469   :  { %v1397_v4 = vmul.f32 %v2561_v2, %v1395_v32  ;;  %2564 = vtanh.f32 %v1371_v52  ;;  %vm1402_vm13 = vweird.f32 %v2561_v2  ;;  %vm1384_vm0 = vmor %vm1382_vm14, %vm1383_vm12  ;;  %vm1421_vm5 = vweird.f32 %v1415_v43  ;;  %v2328_v32 = vld [vmem:[#allocation11 + $0xa0] sm:$0xf] }
 0x46a   :  { %v1379_v10 = vsub.f32 1.0, %v1378_v3  ;;  %vm1403_vm1 = vmor %vm1401_vm15, %vm1402_vm13  ;;  %v1425_v55 = vand.u32 2147483647, %v1415_v43  ;;  %v1428_v24 = vor.u32 1.1754944e-38, %v1427_v5  ;;  %v2349_v26 = vor.u32 %v2450_v9, %v2346_v20  ;;  %v2322_v3 = vld [vmem:[#allocation11 + $0x98] sm:$0xf0] }
 0x46b   :  { %v1398_v14 = vsub.f32 1.0, %v1397_v4  ;;  %v2329_v35 = vor.u32 %v2448_v33, %v2328_v32  ;;  %v2356_v4 = vld [vmem:[#allocation11 + $0xe8] sm:$0xf]  ;;  %v2452_v5 = vld [vmem:[#allocation11 + $0xd4] sm:$0xf0] }
 0x46c   :  { %v1380_v12 = vmul.f32 %v2559_v44, %v1379_v10  ;;  %vm1426_vm7 = vcmp.eq.f32.partialorder %v1425_v55, 8.507059e+37  ;;  %v2320_v9 = vld [vmem:[#allocation11 + $0x88] sm:$0xf]  ;;  %v2268_v32 = vld [vmem:[#allocation11] sm:$0xf] }
 0x46d   :  { %v1399_v28 = vmul.f32 %v2561_v2, %v1398_v14  ;;  %v2433_v33 = vld [vmem:[#allocation11 + $0xc] sm:$0xf0] }
 0x46e   :  { %v2563_v62 = vpop.eup %2562  ;;  %v1381_v40 = vadd.f32 %v2559_v44, %v1380_v12 }
 0x46f   :  { %v1400_v39 = vadd.f32 %v2561_v2, %v1399_v28  ;;  %v1417_v29 = vmul.f32 %v2563_v62, %v1415_v43  ;;  %v2565_v54 = vpop.eup %2564  ;;  %vm1422_vm4 = vweird.f32 %v2563_v62  ;;  %v2334_v43 = vld [vmem:[#allocation11 + $0xb8] sm:$0xf0] }
 0x470   :  { %v1385_v36 = vsel %vm1384_vm0, %v2559_v44, %v1381_v40  ;;  %vm1423_vm6 = vmor %vm1421_vm5, %vm1422_vm4  ;;  %v2316_v44 = vld [vmem:[#allocation11 + $0x80] sm:$0xf]  ;;  %v2337_v52 = vor.u32 %v2447_v34, %v2334_v43 }
 0x471   :  { %v1390_v17 = vsel %vm1387_vm2, %v1389_v46, %v1385_v36  ;;  %v1404_v16 = vsel %vm1403_vm1, %v2561_v2, %v1400_v39  ;;  %v1418_v31 = vsub.f32 1.0, %v1417_v29  ;;  %v2444_v2 = vld [vmem:[#allocation11 + $0x8c] sm:$0xf]  ;;  %v2317_v56 = vor.u32 %v2445_v51, %v2316_v44 }
 0x472   :  { %v1409_v18 = vsel %vm1406_vm3, %v1408_v11, %v1404_v16  ;;  %v1432_v0 = vmul.f32 %v2565_v54, %v1390_v17  ;;  %v2325_v40 = vor.u32 %v2444_v2, %v2322_v3  ;;  %v2304_v54 = vld [vmem:[#allocation11 + $0x60] sm:$0xf]  ;;  %v2432_v44 = vld [vmem:[#allocation11 + $0xc] sm:$0xf]  ;;  %v2274_v3 = vld [vmem:[#allocation11 + $0x18] sm:$0xf0] }
 0x473   :  { %v1431_v25 = vmul.f32 %v1409_v18, %v3256_v58  ;;  %v1419_v19 = vmul.f32 %v2563_v62, %v1418_v31  ;;  %v2352_v58 = vld [vmem:[#allocation11 + $0xe0] sm:$0xf]  ;;  %v2442_v31 = vld [vmem:[#allocation11 + $0x6c] sm:$0xf0] }
 0x474   :  { %v2353_v41 = vor.u32 %v2454_v27, %v2352_v58  ;;  %v2305_v18 = vor.u32 %v2442_v31, %v2304_v54  ;;  %v2298_v58 = vld [vmem:[#allocation11 + $0x58] sm:$0xf0]  ;;  %v2332_v27 = vld [vmem:[#allocation11 + $0xa8] sm:$0xf] }
 0x475   :  { %v3296_v57 = vadd.f32 %v1432_v0, %v1431_v25  ;;  %v1420_v23 = vadd.f32 %v2563_v62, %v1419_v19  ;;  %v2441_v0 = vld [vmem:[#allocation11 + $0x6c] sm:$0xf]  ;;  %v2310_v25 = vld [vmem:[#allocation11 + $0x78] sm:$0xf0] }
 0x476   :  { %v2313_v19 = vor.u32 %v2441_v0, %v2310_v25  ;;  %v2440_v0 = vld [vmem:[#allocation11 + $0x54] sm:$0xf0] }
 0x477   :  { %2566 = vtanh.f32 %v3296_v57  ;;  %v1424_v42 = vsel %vm1423_vm6, %v2563_v62, %v1420_v23  ;;  %v2357_v62 = vor.u32 %v2455_v15, %v2356_v4  ;;  %v2344_v23 = vld [vmem:[#allocation11 + $0xc8] sm:$0xf] }
 0x478   :  { %v1429_v45 = vsel %vm1426_vm7, %v1428_v24, %v1424_v42  ;;  %v2345_v42 = vor.u32 %v2452_v5, %v2344_v23  ;;  %v2292_v24 = vld [vmem:[#allocation11 + $0x40] sm:$0xf]  ;;  %v2308_v15 = vld [vmem:[#allocation11 + $0x68] sm:$0xf] }
 0x47d   :  { %v2567_v50 = vpop.eup %2566 }
 0x47e   :  { %v1435_v6 = vmul.f32 %v2567_v50, %v1429_v45  ;;  %v2439_v50 = vld [vmem:[#allocation11 + $0x4c] sm:$0xf0]  ;;  %v2438_v45 = vld [vmem:[#allocation11 + $0x4c] sm:$0xf] }
 0x480   :  { %v1436_v30 = vpack.c.bf16 %v1435_v6, %v1435_v6 }
 0x482   :  { %1452 = vmatmul.bf16.vlgmr.msrb.gmra.mxu0 %v1436_v30  ;;  %1465 = vmatmul.bf16.vlgmr.msrb.gmra.mxu1 %v1436_v30 }
 0x483   :  { %1478 = vmatmul.bf16.vlgmr.msrb.gmra.mxu2 %v1436_v30  ;;  %1491 = vmatmul.bf16.vlgmr.msrb.gmra.mxu3 %v1436_v30  ;;  %v2293_v30 = vor.u32 %v2439_v50, %v2292_v24 }
 0x484   :  { %1860 = vmatpush.bf16.msrb.mxu0 %v2353_v41  ;;  %1886 = vmatpush.bf16.msrb.mxu2 %v2361_v48  ;;  %v3403_v41 = vld [vmem:[#allocation35_spill] sm:$0xff]  ;;  %v2301_v48 = vor.u32 %v2438_v45, %v2298_v58 }
 0x485   :  { %1873 = vmatpush.bf16.msrb.mxu1 %v2357_v62  ;;  %v2434_v58 = vld [vmem:[#allocation11 + $0x14] sm:$0xf0] }
 0x488   :  { %1861 = vmatpush.bf16.msrb.mxu0 %v2341_v13  ;;  %1887 = vmatpush.bf16.msrb.mxu2 %v2349_v26  ;;  %v2446_v13 = vld [vmem:[#allocation11 + $0x94] sm:$0xf0] }
 0x489   :  { %1874 = vmatpush.bf16.msrb.mxu1 %v2345_v42  ;;  %v2321_v2 = vor.u32 %v2446_v13, %v2320_v9  ;;  %v2437_v42 = vld [vmem:[#allocation11 + $0x34] sm:$0xf0] }
 0x48c   :  { %1862 = vmatpush.bf16.msrb.mxu0 %v2329_v35  ;;  %1888 = vmatpush.bf16.msrb.mxu2 %v2337_v52 }
 0x490   :  { %1863 = vmatpush.bf16.msrb.mxu0 %v2317_v56  ;;  %1889 = vmatpush.bf16.msrb.mxu2 %v2325_v40 }
 0x494   :  { %1864 = vmatpush.bf16.msrb.mxu0 %v2305_v18  ;;  %1890 = vmatpush.bf16.msrb.mxu2 %v2313_v19  ;;  %v2296_v18 = vld [vmem:[#allocation11 + $0x48] sm:$0xf] }
 0x495   :  { %v2297_v23 = vor.u32 %v2440_v0, %v2296_v18 }
 0x498   :  { %1865 = vmatpush.bf16.msrb.mxu0 %v2293_v30  ;;  %1891 = vmatpush.bf16.msrb.mxu2 %v2301_v48 }
 0x4ff   :  { %v1453_v49 = vpop.f32.mrf.mxu0  ;;  %v1466_v53 = vpop.f32.mrf.mxu1 }
 0x500   :  { %v1496_v60 = vadd.f32 %v1453_v49, %v3400_v59  ;;  %v1497_v1 = vadd.f32 %v1466_v53, %v3401_v61  ;;  %v2449_v49 = vld [vmem:[#allocation11 + $0xb4] sm:$0xf0]  ;;  %v2280_v53 = vld [vmem:[#allocation11 + $0x20] sm:$0xf]  ;;  %v2436_v59 = vld [vmem:[#allocation11 + $0x2c] sm:$0xf0] }
 0x502   :  { %v2260_v21 = vmul.f32 -1.442695, %v1496_v60  ;;  %v2261_v22 = vmul.f32 -1.442695, %v1497_v1  ;;  %v2435_v1 = vld [vmem:[#allocation11 + $0x2c] sm:$0xf] }
 0x503   :  { %v2289_v26 = vor.u32 %v2435_v1, %v2286_v7  ;;  %v3405_v7 = vld [vmem:[#allocation38_spill] sm:$0xff] }
 0x504   :  { %2568 = vpow2.f32 %v2260_v21  ;;  %v2333_v21 = vor.u32 %v2449_v49, %v2332_v27 }
 0x505   :  { %2570 = vpow2.f32 %v2261_v22  ;;  %v2281_v22 = vor.u32 %v2436_v59, %v2280_v53  ;;  %1892 = vmatpush.bf16.msrb.mxu2 %v2289_v26 }
 0x506   :  { %v1479_v10 = vpop.f32.mrf.mxu2  ;;  %v1492_v14 = vpop.f32.mrf.mxu3  ;;  %1875 = vmatpush.bf16.msrb.mxu1 %v2333_v21 }
 0x507   :  { %v1499_v12 = vadd.f32 %v1492_v14, %v3402_v63  ;;  %v1455_v38 = vpop.f32.mrf.mxu0  ;;  %v1468_v28 = vpop.f32.mrf.mxu1  ;;  %v1498_v47 = vadd.f32 %v1479_v10, %v3403_v41  ;;  %1866 = vmatpush.bf16.msrb.mxu0 %v2281_v22  ;;  %v2269_v14 = vor.u32 %v2433_v33, %v2268_v32  ;;  %v2443_v63 = vld [vmem:[#allocation11 + $0x74] sm:$0xf0]  ;;  %v3406_v22 = vld [vmem:[#allocation40_spill] sm:$0xff] }
 0x508   :  { %v2277_v28 = vor.u32 %v2432_v44, %v2274_v3 }
 0x509   :  { %v2262_v46 = vmul.f32 -1.442695, %v1499_v12 }
 0x50a   :  { %v2569_v39 = vpop.eup %2568  ;;  %1876 = vmatpush.bf16.msrb.mxu1 %v2321_v2  ;;  %1893 = vmatpush.bf16.msrb.mxu2 %v2277_v28 }
 0x50b   :  { %v2571_v29 = vpop.eup %2570  ;;  %v3302_v11 = vadd.f32 1.0, %v2569_v39  ;;  %2572 = vpow2.f32 %v2262_v46  ;;  %1867 = vmatpush.bf16.msrb.mxu0 %v2269_v14 }
 0x50c   :  { %v3304_v36 = vadd.f32 1.0, %v2571_v29  ;;  %v2309_v29 = vor.u32 %v2443_v63, %v2308_v15 }
 0x50d   :  { %2574 = vrcp.f32 %v3302_v11  ;;  %v1513_v35 = vand.u32 2147483647, %v3302_v11  ;;  %v1515_v43 = vand.u32 2147483648, %v3302_v11  ;;  %vm1509_vm10 = vweird.f32 %v3302_v11 }
 0x50e   :  { %2576 = vrcp.f32 %v3304_v36  ;;  %v1481_v17 = vpop.f32.mrf.mxu2  ;;  %v1494_v16 = vpop.f32.mrf.mxu3  ;;  %v1534_v51 = vand.u32 2147483648, %v3304_v36  ;;  %v1532_v10 = vand.u32 2147483647, %v3304_v36  ;;  %vm1528_vm11 = vweird.f32 %v3304_v36  ;;  %1877 = vmatpush.bf16.msrb.mxu1 %v2309_v29 }
 0x50f   :  { %v1516_v56 = vor.u32 1.1754944e-38, %v1515_v43  ;;  %vm1514_vm14 = vcmp.eq.f32.partialorder %v1513_v35, 8.507059e+37  ;;  %v3336_v35 = vld [vmem:[%s3358_s5] sm:$0xf]  ;;  %s2774_s5 = smov [#allocation12]  }
 0x510   :  { %v1535_v46 = vor.u32 1.1754944e-38, %v1534_v51  ;;  %vm1533_vm15 = vcmp.eq.f32.partialorder %v1532_v10, 8.507059e+37  ;;  %v1726_v2 = vperm.slane %v3336_v35, 0  ;;  %s1949_s23 = sshll.u32 %s2774_s5, 4  ;;  %s1950_s23 = int_to_ptr.vmem [resolvable:$true] %s1949_s23 }
 0x511   :  { %v2573_v55 = vpop.eup %2572 }
 0x512   :  { %v3308_v6 = vadd.f32 1.0, %v2573_v55  ;;  %v2284_v55 = vld [vmem:[#allocation11 + $0x28] sm:$0xf]  ;;  %1878 = vmatpush.bf16.msrb.mxu1 %v2297_v23 }
 0x513   :  { %v2575_v37 = vpop.eup %2574  ;;  %v2285_v30 = vor.u32 %v2437_v42, %v2284_v55 }
 0x514   :  { %v2577_v60 = vpop.eup %2576  ;;  %v1505_v61 = vmul.f32 %v2575_v37, %v3302_v11  ;;  %2578 = vrcp.f32 %v3308_v6  ;;  %vm1510_vm8 = vweird.f32 %v2575_v37  ;;  %v1554_v50 = vand.u32 2147483648, %v3308_v6 }
 0x515   :  { %v1524_v8 = vmul.f32 %v2577_v60, %v3304_v36  ;;  %2580 = vtanh.f32 %v1498_v47  ;;  %vm1529_vm9 = vweird.f32 %v2577_v60  ;;  %vm1511_vm12 = vmor %vm1509_vm10, %vm1510_vm8  ;;  %vm1548_vm1 = vweird.f32 %v3308_v6 }
 0x516   :  { %v1506_v20 = vsub.f32 1.0, %v1505_v61  ;;  %vm1530_vm13 = vmor %vm1528_vm11, %vm1529_vm9  ;;  %v1552_v45 = vand.u32 2147483647, %v3308_v6  ;;  %1879 = vmatpush.bf16.msrb.mxu1 %v2285_v30  ;;  %v3404_v61 = vld [vmem:[#allocation37_spill] sm:$0xff] }
 0x517   :  { %v1525_v34 = vsub.f32 1.0, %v1524_v8 }
 0x518   :  { %v1507_v52 = vmul.f32 %v2575_v37, %v1506_v20  ;;  %vm1553_vm3 = vcmp.eq.f32.partialorder %v1552_v45, 8.507059e+37 }
 0x519   :  { %v1526_v4 = vmul.f32 %v2577_v60, %v1525_v34 }
 0x51a   :  { %v2579_v12 = vpop.eup %2578  ;;  %v1508_v38 = vadd.f32 %v2575_v37, %v1507_v52 }
 0x51b   :  { %v1527_v62 = vadd.f32 %v2577_v60, %v1526_v4  ;;  %v1544_v40 = vmul.f32 %v2579_v12, %v3308_v6  ;;  %v2581_v54 = vpop.eup %2580  ;;  %vm1549_vm0 = vweird.f32 %v2579_v12  ;;  %v1691_v6 = vld [vmem:[#allocation3 + $0x1c] sm:$0xf] }
 0x51c   :  { %v1512_v39 = vsel %vm1511_vm12, %v2575_v37, %v1508_v38  ;;  %vm1550_vm2 = vmor %vm1548_vm1, %vm1549_vm0  ;;  %v1555_v37 = vor.u32 1.1754944e-38, %v1554_v50 }
 0x51d   :  { %v1517_v17 = vsel %vm1514_vm14, %v1516_v56, %v1512_v39  ;;  %v1531_v11 = vsel %vm1530_vm13, %v2577_v60, %v1527_v62  ;;  %v1545_v16 = vsub.f32 1.0, %v1544_v40  ;;  %v3407_v56 = vld [vmem:[#allocation39_spill] sm:$0xff]  ;;  %v1728_v40 = vperm.slane %v3336_v35, 3 }
 0x51e   :  { %v1536_v36 = vsel %vm1533_vm15, %v1535_v46, %v1531_v11  ;;  %v1559_v31 = vmul.f32 %v2581_v54, %v1517_v17 }
 0x51f   :  { %v1558_v25 = vmul.f32 %v1536_v36, %v3296_v57  ;;  %v1546_v19 = vmul.f32 %v2579_v12, %v1545_v16  ;;  %v2272_v57 = vld [vmem:[#allocation11 + $0x8] sm:$0xf] }
 0x520   :  { %v2273_v41 = vor.u32 %v2434_v58, %v2272_v57 }
 0x521   :  { %v3324_v5 = vadd.f32 %v1559_v31, %v1558_v25  ;;  %v1547_v24 = vadd.f32 %v2579_v12, %v1546_v19 }
 0x522   :  { %1880 = vmatpush.bf16.msrb.mxu1 %v2273_v41 }
 0x523   :  { %2582 = vtanh.f32 %v3324_v5  ;;  %v1551_v27 = vsel %vm1550_vm2, %v2579_v12, %v1547_v24 }
 0x524   :  { %v1556_v48 = vsel %vm1553_vm3, %v1555_v37, %v1551_v27 }
 0x529   :  { %v2583_v47 = vpop.eup %2582 }
 0x52a   :  { %v1562_v49 = vmul.f32 %v2583_v47, %v1556_v48 }
 0x52c   :  { %v1563_v53 = vpack.c.bf16 %v1562_v49, %v1562_v49 }
 0x52e   :  { %1579 = vmatmul.bf16.vlgmr.msra.gmra.mxu0 %v1563_v53  ;;  %1592 = vmatmul.bf16.vlgmr.msra.gmra.mxu1 %v1563_v53 }
 0x52f   :  { %1605 = vmatmul.bf16.vlgmr.msra.gmra.mxu2 %v1563_v53  ;;  %1618 = vmatmul.bf16.vlgmr.msra.gmra.mxu3 %v1563_v53 }
 0x53e   :  { %1868 = vmatmul.bf16.vlgmr.msrb.gmra.mxu0 %v1691_v6  ;;  %1881 = vmatmul.bf16.vlgmr.msrb.gmra.mxu1 %v1691_v6 }
 0x53f   :  { %1894 = vmatmul.bf16.vlgmr.msrb.gmra.mxu2 %v1691_v6 }
 0x5ab   :  { %v1580_v59 = vpop.f32.mrf.mxu0  ;;  %v1593_v60 = vpop.f32.mrf.mxu1 }
 0x5ac   :  { %v1623_v1 = vadd.f32 %v1580_v59, %v3404_v61  ;;  %v1624_v8 = vadd.f32 %v1593_v60, %v3405_v7  ;;  %v1727_v60 = vperm.slane %v3336_v35, 2 }
 0x5ae   :  { %v2263_v9 = vmul.f32 -1.442695, %v1623_v1  ;;  %v2264_v13 = vmul.f32 -1.442695, %v1624_v8 }
 0x5b0   :  { %2584 = vpow2.f32 %v2263_v9 }
 0x5b1   :  { %2586 = vpow2.f32 %v2264_v13 }
 0x5b2   :  { %v1606_v20 = vpop.f32.mrf.mxu2  ;;  %v1619_v21 = vpop.f32.mrf.mxu3 }
 0x5b3   :  { %v1626_v26 = vadd.f32 %v1619_v21, %v3406_v22  ;;  %v1582_v32 = vpop.f32.mrf.mxu0  ;;  %v1595_v33 = vpop.f32.mrf.mxu1  ;;  %v1625_v62 = vadd.f32 %v1606_v20, %v3407_v56 }
 0x5b5   :  { %v2265_v34 = vmul.f32 -1.442695, %v1626_v26 }
 0x5b6   :  { %v2585_v43 = vpop.eup %2584 }
 0x5b7   :  { %v2587_v44 = vpop.eup %2586  ;;  %v1630_v51 = vadd.f32 1.0, %v2585_v43  ;;  %2588 = vpow2.f32 %v2265_v34 }
 0x5b8   :  { %v1649_v52 = vadd.f32 1.0, %v2587_v44 }
 0x5b9   :  { %2590 = vrcp.f32 %v1630_v51  ;;  %v1642_v16 = vand.u32 2147483648, %v1630_v51  ;;  %v1640_v19 = vand.u32 2147483647, %v1630_v51  ;;  %vm1636_vm7 = vweird.f32 %v1630_v51 }
 0x5ba   :  { %2592 = vrcp.f32 %v1649_v52  ;;  %v1608_v3 = vpop.f32.mrf.mxu2  ;;  %v1621_v4 = vpop.f32.mrf.mxu3  ;;  %v1661_v0 = vand.u32 2147483648, %v1649_v52  ;;  %v1659_v55 = vand.u32 2147483647, %v1649_v52  ;;  %vm1655_vm6 = vweird.f32 %v1649_v52 }
 0x5bb   :  { %v1869_v10 = vpop.f32.mrf.mxu0  ;;  %v1882_v14 = vpop.f32.mrf.mxu1  ;;  %v1643_v30 = vor.u32 1.1754944e-38, %v1642_v16  ;;  %vm1641_vm10 = vcmp.eq.f32.partialorder %v1640_v19, 8.507059e+37 }
 0x5bc   :  { %v1870_v15 = vadd.f32 %v1869_v10, %v1726_v2  ;;  %v1662_v27 = vor.u32 1.1754944e-38, %v1661_v0  ;;  %vm1660_vm11 = vcmp.eq.f32.partialorder %v1659_v55, 8.507059e+37  ;;  %v1883_v20 = vadd.f32 %v1882_v14, %v1727_v60 }
 0x5bd   :  { %v2589_v63 = vpop.eup %2588 }
 0x5be   :  { %v3339_v12 = vadd.f32 1.0, %v2589_v63  ;;  %v2362_v38 = vmul.f32 -1.442695, %v1870_v15 }
 0x5bf   :  { %v2591_v28 = vpop.eup %2590 }
 0x5c0   :  { %v2593_v46 = vpop.eup %2592  ;;  %v1632_v39 = vmul.f32 %v2591_v28, %v1630_v51  ;;  %2594 = vrcp.f32 %v3339_v12  ;;  %vm1637_vm4 = vweird.f32 %v2591_v28  ;;  %v1681_v22 = vand.u32 2147483648, %v3339_v12 }
 0x5c1   :  { %v1651_v29 = vmul.f32 %v2593_v46, %v1649_v52  ;;  %2596 = vpow2.f32 %v2362_v38  ;;  %vm1656_vm5 = vweird.f32 %v2593_v46  ;;  %vm1638_vm8 = vmor %vm1636_vm7, %vm1637_vm4  ;;  %vm1675_vm13 = vweird.f32 %v3339_v12 }
 0x5c2   :  { %v1633_v54 = vsub.f32 1.0, %v1632_v39  ;;  %v1895_v17 = vpop.f32.mrf.mxu2  ;;  %2598 = vtanh.f32 %v1625_v62  ;;  %vm1657_vm9 = vmor %vm1655_vm6, %vm1656_vm5  ;;  %v1679_v32 = vand.u32 2147483647, %v3339_v12  ;;  %v1682_v35 = vor.u32 1.1754944e-38, %v1681_v22 }
 0x5c3   :  { %v1652_v11 = vsub.f32 1.0, %v1651_v29  ;;  %v1896_v36 = vadd.f32 %v1895_v17, %v1728_v40  ;;  %v1871_v31 = vpop.f32.mrf.mxu0  ;;  %v1884_v18 = vpop.f32.mrf.mxu1 }
 0x5c4   :  { %v1634_v25 = vmul.f32 %v2591_v28, %v1633_v54  ;;  %vm1680_vm15 = vcmp.eq.f32.partialorder %v1679_v32, 8.507059e+37 }
 0x5c5   :  { %v1653_v23 = vmul.f32 %v2593_v46, %v1652_v11  ;;  %v2363_v42 = vmul.f32 -1.442695, %v1896_v36 }
 0x5c6   :  { %v2595_v24 = vpop.eup %2594  ;;  %v1635_v50 = vadd.f32 %v2591_v28, %v1634_v25 }
 0x5c7   :  { %v2597_v45 = vpop.eup %2596  ;;  %v1654_v57 = vadd.f32 %v2593_v46, %v1653_v23  ;;  %v1671_v58 = vmul.f32 %v2595_v24, %v3339_v12  ;;  %2600 = vpow2.f32 %v2363_v42  ;;  %vm1676_vm12 = vweird.f32 %v2595_v24 }
 0x5c8   :  { %v1639_v37 = vsel %vm1638_vm8, %v2591_v28, %v1635_v50  ;;  %v1902_v41 = vadd.f32 1.0, %v2597_v45  ;;  %v2599_v47 = vpop.eup %2598  ;;  %vm1677_vm14 = vmor %vm1675_vm13, %vm1676_vm12 }
 0x5c9   :  { %v1644_v48 = vsel %vm1641_vm10, %v1643_v30, %v1639_v37  ;;  %v1658_v49 = vsel %vm1657_vm9, %v2593_v46, %v1654_v57  ;;  %v1672_v53 = vsub.f32 1.0, %v1671_v58 }
 0x5ca   :  { %v1663_v6 = vsel %vm1660_vm11, %v1662_v27, %v1658_v49  ;;  %v1686_v59 = vmul.f32 %v2599_v47, %v1644_v48  ;;  %2602 = vrcp.f32 %v1902_v41  ;;  %v1897_v61 = vpop.f32.mrf.mxu2  ;;  %v1914_v43 = vand.u32 2147483648, %v1902_v41 }
 0x5cb   :  { %v1685_v1 = vmul.f32 %v1663_v6, %v3324_v5  ;;  %v1673_v7 = vmul.f32 %v2595_v24, %v1672_v53  ;;  %v1912_v52 = vand.u32 2147483647, %v1902_v41  ;;  %vm1908_vm1 = vweird.f32 %v1902_v41 }
 0x5cc   :  { %v1915_v63 = vor.u32 1.1754944e-38, %v1914_v43 }
 0x5cd   :  { %v2601_v8 = vpop.eup %2600  ;;  %v1687_v9 = vadd.f32 %v1686_v59, %v1685_v1  ;;  %v1674_v21 = vadd.f32 %v2595_v24, %v1673_v7  ;;  %vm1913_vm3 = vcmp.eq.f32.partialorder %v1912_v52, 8.507059e+37 }
 0x5ce   :  { %v1922_v13 = vadd.f32 1.0, %v2601_v8 }
 0x5cf   :  { %2604 = vtanh.f32 %v1687_v9  ;;  %v1678_v5 = vsel %vm1677_vm14, %v2595_v24, %v1674_v21 }
 0x5d0   :  { %v2603_v26 = vpop.eup %2602  ;;  %2606 = vrcp.f32 %v1922_v13  ;;  %v1683_v2 = vsel %vm1680_vm15, %v1682_v35, %v1678_v5  ;;  %v1934_v46 = vand.u32 2147483648, %v1922_v13  ;;  %vm1928_vm5 = vweird.f32 %v1922_v13 }
 0x5d1   :  { %v1904_v33 = vmul.f32 %v2603_v26, %v1902_v41  ;;  %2608 = vtanh.f32 %v1883_v20  ;;  %vm1909_vm0 = vweird.f32 %v2603_v26  ;;  %v1932_v39 = vand.u32 2147483647, %v1922_v13 }
 0x5d2   :  { %vm1910_vm2 = vmor %vm1908_vm1, %vm1909_vm0  ;;  %v1935_v54 = vor.u32 1.1754944e-38, %v1934_v46 }
 0x5d3   :  { %v1905_v34 = vsub.f32 1.0, %v1904_v33  ;;  %vm1933_vm7 = vcmp.eq.f32.partialorder %v1932_v39, 8.507059e+37 }
 0x5d5   :  { %v2605_v44 = vpop.eup %2604  ;;  %v1906_v51 = vmul.f32 %v2603_v26, %v1905_v34 }
 0x5d6   :  { %v2607_v3 = vpop.eup %2606  ;;  %v1689_v4 = vmul.f32 %v2605_v44, %v1683_v2 }
 0x5d7   :  { %v1924_v10 = vmul.f32 %v2607_v3, %v1922_v13  ;;  %v1907_v14 = vadd.f32 %v2603_v26, %v1906_v51  ;;  %v2609_v15 = vpop.eup %2608  ;;  %vm1929_vm4 = vweird.f32 %v2607_v3 }
 0x5d8   :  { %vm1930_vm6 = vmor %vm1928_vm5, %vm1929_vm4 }
 0x5d9   :  { %v1925_v12 = vsub.f32 1.0, %v1924_v10  ;;  %v1911_v38 = vsel %vm1910_vm2, %v2603_v26, %v1907_v14 }
 0x5da   :  { %v1916_v28 = vsel %vm1913_vm3, %v1915_v63, %v1911_v38 }
 0x5db   :  { %v1938_v56 = vmul.f32 %v2609_v15, %v1916_v28  ;;  %v1926_v62 = vmul.f32 %v2607_v3, %v1925_v12 }
 0x5dd   :  { %2610 = vtanh.f32 %v1938_v56  ;;  %v1927_v40 = vadd.f32 %v2607_v3, %v1926_v62 }
 0x5df   :  { %v1931_v29 = vsel %vm1930_vm6, %v2607_v3, %v1927_v40 }
 0x5e0   :  { %v1936_v11 = vsel %vm1933_vm7, %v1935_v54, %v1931_v29 }
 0x5e3   :  { %v2611_v17 = vpop.eup %2610 }
 0x5e4   :  { %v1940_v16 = vmul.f32 %v2611_v17, %v1936_v11 }
 0x5e6   :  { %v2459_v36 = vpack.c.bf16 %v1940_v16, %v1689_v4 }
 0x5e8   :  { %2460 = vst [vmem:[#allocation12] sm:$0xff] %v2459_v36  }
 0x5e9   :  { %1954 = dma.vmem_to_hbm [thread:$0]  %s1950_s23, 128, %s1952_s26, [#allocation5]  }
 0x5ea   :  { %2762 = dma.done.wait [#allocation5], 128  }
 0x5eb   :  { %2763 = vsyncadd [#allocation5], 4294967168 }
 0x5ec   :  { %1959 = vsyncpa [#allocation4], 1 }
 0x5ed   :  { %1960 = vsyncpa [#allocation7], 1 }
 0x5ee   :  { %1961 = vsyncpa [#allocation10], 1 }
 0x5ef   :  { %1962 = vsyncpa [#allocation5], 1 }

</bundles_post_ra>
